<compile_context>
chip_gen: v6e
topology: v6e:2x2x1
jax: 0.10.0
libtpu: 0.0.40
codegen_flags: <defaults>
</compile_context>

<pallas_src>
import jax
import jax.numpy as jnp
from jax.experimental import pallas as pl
from jax.experimental.pallas import tpu as pltpu

# ---------------- config (small, consistent with the module's forward) ----------------
B = 2                 # batch
C = 3                 # image channels
IMG = 16              # image spatial size
PATCH = 8             # patch size
GRID = IMG // PATCH
NUM_PATCHES = GRID * GRID           # 4
SEQ = NUM_PATCHES + 1               # 5 = CLS + patches (real tokens)
SEQ_P = 8                           # token axis padded to the 8-sublane tile
CPP = C * PATCH * PATCH             # 192 (im2col patch length)
VIT_D = 32            # vit.config.hidden_size
NHEADS = 2
HEAD_D = VIT_D // NHEADS
MLP_D = 4 * VIT_D
VIT_LAYERS = 2
RNN_H = 16            # rnn_hidden_size
RNN_LAYERS = 2        # rnn_num_layers (kernel hard-codes 2 LSTM cells per step)
COORD = 2             # coord_dim
NUM_POINTS = 4        # num_points -> 3 decoder steps
STEPS = NUM_POINTS - 1
LN_EPS = 1e-12
SLAB_COLS = 128       # lane width of the packed weight slabs


# ---------------- packed-weight slab layouts (static, shared by packer & kernel) -------
def _bf16_spec():
    spec = [("w_patch", CPP, VIT_D)]
    for l in range(VIT_LAYERS):
        spec += [
            (f"wqkv_{l}", VIT_D, 3 * VIT_D),
            (f"wo_{l}", VIT_D, VIT_D),
            (f"w1_{l}", VIT_D, MLP_D),
            (f"w2_{l}", MLP_D, VIT_D),
        ]
    return spec


def _f32_spec():
    spec = [("bias_grid", SEQ_P, VIT_D)]
    for l in range(VIT_LAYERS):
        spec += [
            (f"ln1g_{l}", 1, VIT_D), (f"ln1b_{l}", 1, VIT_D),
            (f"bqkv_{l}", 1, 3 * VIT_D), (f"bo_{l}", 1, VIT_D),
            (f"ln2g_{l}", 1, VIT_D), (f"ln2b_{l}", 1, VIT_D),
            (f"b1_{l}", 1, MLP_D), (f"b2_{l}", 1, VIT_D),
        ]
    spec += [
        ("lnfg", 1, VIT_D), ("lnfb", 1, VIT_D),
        ("w_init", VIT_D, RNN_H), ("b_init", 1, RNN_H),
        ("w_lstm0", COORD + RNN_H, 4 * RNN_H), ("b_lstm0", 1, 4 * RNN_H),
        ("w_lstm1", 2 * RNN_H, 4 * RNN_H), ("b_lstm1", 1, 4 * RNN_H),
        ("w_attn_dec", RNN_H, RNN_H), ("w_attn_enc", VIT_D, RNN_H),
        ("b_attn", 1, RNN_H), ("v_attn", 1, RNN_H),
        ("w_out", RNN_H + VIT_D, COORD), ("b_out", 1, COORD),
    ]
    return spec


def _build_layout(spec):
    layout, off = {}, 0
    for name, rows, cols in spec:
        assert cols <= SLAB_COLS
        layout[name] = (off, rows, cols)
        off += -(-rows // 8) * 8          # 8-sublane aligned entries
    return layout, off


BF_LAYOUT, BF_ROWS = _build_layout(_bf16_spec())
F32_LAYOUT, F32_ROWS = _build_layout(_f32_spec())


# ---------------- the single fused forward kernel (one batch sample per grid step) -----
def fused_forward_kernel(patches_ref, coord0_ref, wb_ref, wf_ref, out_ref):
    f32 = jnp.float32
    bf16 = jnp.bfloat16
    scale = 1.0 / (HEAD_D ** 0.5)
    neg_big = jnp.float32(-1e30)

    # Static slices into the packed weight slabs (zero-cost views).
    def bw(name):
        off, r, c = BF_LAYOUT[name]
        return wb_ref[off:off + r, 0:c]

    def fw(name):
        off, r, c = F32_LAYOUT[name]
        return wf_ref[off:off + r, 0:c]

    def mxu(a, w_bf16):
        # bf16 operands (weights pre-cast at init), f32 accumulation.
        return jnp.dot(a.astype(bf16), w_bf16, preferred_element_type=f32)

    def dot32(a, w):
        return jnp.dot(a, w, preferred_element_type=f32)

    def layer_norm(z, g, b):
        mu = jnp.mean(z, axis=-1, keepdims=True)
        var = jnp.mean(jnp.square(z - mu), axis=-1, keepdims=True)
        return (z - mu) * jax.lax.rsqrt(var + LN_EPS) * g + b

    # Masks over the padded token axis (rows / keys >= SEQ are padding).
    key_mask = jax.lax.broadcasted_iota(jnp.int32, (1, 1, SEQ_P), 2) < SEQ
    row_mask_b = jax.lax.broadcasted_iota(jnp.int32, (SEQ_P, 1), 0) < SEQ
    row_mask_f = row_mask_b.astype(f32)

    # ---- ViT patch embedding (conv rewritten as im2col matmul) ----
    # bias_grid row 0 = cls + pos[0]; rows 1..SEQ-1 = pos[i] + conv bias; pad rows = 0.
    # CLS/pad rows of `patches` are zero, so this reproduces [cls; conv(patches)] + pos.
    x = mxu(patches_ref[...], bw("w_patch")) + fw("bias_grid")          # (SEQ_P, D)

    # ---- ViT encoder layers (pre-LN MHA + MLP), statically unrolled ----
    for l in range(VIT_LAYERS):
        xn = layer_norm(x, fw(f"ln1g_{l}"), fw(f"ln1b_{l}"))
        qkv = mxu(xn, bw(f"wqkv_{l}")) + fw(f"bqkv_{l}")                # (SEQ_P, 3D)

        def split_heads(m):  # (SEQ_P, D) -> (NHEADS, SEQ_P, HEAD_D)
            return jnp.stack(
                [m[:, h * HEAD_D:(h + 1) * HEAD_D] for h in range(NHEADS)], axis=0)

        qh = split_heads(qkv[:, 0:VIT_D])
        kh = split_heads(qkv[:, VIT_D:2 * VIT_D])
        vh = split_heads(qkv[:, 2 * VIT_D:3 * VIT_D])
        # One batched einsum pair over all heads; single softmax (padded keys masked).
        s = jnp.einsum("hqd,hkd->hqk", qh, kh, preferred_element_type=f32) * scale
        s = jnp.where(key_mask, s, neg_big)
        p = jax.nn.softmax(s, axis=-1)
        ctx = jnp.einsum("hqk,hkd->hqd", p, vh, preferred_element_type=f32)
        ctx2 = jnp.concatenate([ctx[h] for h in range(NHEADS)], axis=-1)  # (SEQ_P, D)

        h1 = x + mxu(ctx2, bw(f"wo_{l}")) + fw(f"bo_{l}")
        hn = layer_norm(h1, fw(f"ln2g_{l}"), fw(f"ln2b_{l}"))
        # TODO(synk): HF ViT uses exact (erf) GELU; tanh-approx GELU used for robust lowering.
        mid = jax.nn.gelu(mxu(hn, bw(f"w1_{l}")) + fw(f"b1_{l}"), approximate=True)
        x = h1 + mxu(mid, bw(f"w2_{l}")) + fw(f"b2_{l}")

    # ---- final LN, masked mean-pool over the 5 real tokens, init-hidden projection ----
    enc = layer_norm(x, fw("lnfg"), fw("lnfb"))                         # (SEQ_P, D)
    gf = jnp.sum(enc * row_mask_f, axis=0, keepdims=True) * (1.0 / SEQ)  # (1, D)
    h_init = dot32(gf, fw("w_init")) + fw("b_init")                     # (1, H)

    # ---- decoder: 2-layer LSTM + additive attention + fc_out, all steps fused ----
    enc_proj = dot32(enc, fw("w_attn_enc"))                             # (SEQ_P, H) hoisted
    w_attn_dec = fw("w_attn_dec")
    b_attn = fw("b_attn")
    v_attn = fw("v_attn")
    w_lstm0, b_lstm0 = fw("w_lstm0"), fw("b_lstm0")
    w_lstm1, b_lstm1 = fw("w_lstm1"), fw("b_lstm1")
    w_out, b_out = fw("w_out"), fw("b_out")

    def lstm_cell(xin, h, c, wcat, bias):
        # ONE fused ([x, h], 4H) matmul; gate columns stored in (i, f, o, g) order so a
        # single sigmoid covers the contiguous first 3H columns (PyTorch order permuted
        # at init).
        gates = dot32(jnp.concatenate([xin, h], axis=1), wcat) + bias   # (1, 4H)
        sig = jax.nn.sigmoid(gates[:, 0:3 * RNN_H])
        i_g = sig[:, 0:RNN_H]
        f_g = sig[:, RNN_H:2 * RNN_H]
        o_g = sig[:, 2 * RNN_H:3 * RNN_H]
        g_g = jnp.tanh(gates[:, 3 * RNN_H:4 * RNN_H])
        c_new = f_g * c + i_g * g_g
        return o_g * jnp.tanh(c_new), c_new

    h0, c0 = h_init, jnp.zeros_like(h_init)        # layer-0 state (h_0 repeated, c_0 = 0)
    h1s, c1s = h_init, jnp.zeros_like(h_init)      # layer-1 state
    cur = coord0_ref[...]                          # (1, COORD)
    preds = []
    for _ in range(STEPS):                         # autoregressive steps, fully in VMEM
        h0, c0 = lstm_cell(cur, h0, c0, w_lstm0, b_lstm0)
        h1s, c1s = lstm_cell(h0, h1s, c1s, w_lstm1, b_lstm1)
        dec_part = dot32(h1s, w_attn_dec)                               # (1, H)
        energy = jnp.tanh(enc_proj + dec_part + b_attn)                 # (SEQ_P, H)
        sc = jnp.sum(energy * v_attn, axis=1, keepdims=True)            # (SEQ_P, 1)
        sc = jnp.where(row_mask_b, sc, neg_big)                         # mask pad tokens
        sc = sc - jnp.max(sc, axis=0, keepdims=True)
        e = jnp.exp(sc)
        aw = e / jnp.sum(e, axis=0, keepdims=True)                      # softmax over SEQ
        ctxv = jnp.sum(aw * enc, axis=0, keepdims=True)                 # (1, D) context
        # ONE fused ([hidden, context], COORD) matmul for fc_out.
        pred = dot32(jnp.concatenate([h1s, ctxv], axis=1), w_out) + b_out  # (1, COORD)
        preds.append(pred)
        cur = pred
    out_ref[...] = jnp.concatenate(preds, axis=0)                       # (STEPS, COORD)


# ---------------- pallas_call wrapper ---------------------------------------------------
def fused_forward(patches, coord0, wb, wf):
    bsz = patches.shape[0]
    out_shape = jax.ShapeDtypeStruct((bsz, STEPS, COORD), jnp.float32)
    return pl.pallas_call(
        fused_forward_kernel,
        out_shape=out_shape,
        grid=(bsz,),
        in_specs=[
            pl.BlockSpec((None, SEQ_P, CPP), lambda b: (b, 0, 0)),       # per-sample patches
            pl.BlockSpec((None, 1, COORD), lambda b: (b, 0, 0)),         # per-sample coord
            pl.BlockSpec((BF_ROWS, SLAB_COLS), lambda b: (0, 0)),        # bf16 weight slab (resident)
            pl.BlockSpec((F32_ROWS, SLAB_COLS), lambda b: (0, 0)),       # f32 param slab (resident)
        ],
        out_specs=pl.BlockSpec((None, STEPS, COORD), lambda b: (b, 0, 0)),
        compiler_params=pltpu.CompilerParams(dimension_semantics=("parallel",)),
    )(patches, coord0, wb, wf)


# ---------------- parameters (deterministic, synthetic) + slab packing ------------------
def _pack(raw, layout, rows, dtype):
    slab = jnp.zeros((rows, SLAB_COLS), dtype)
    for name, (off, r, c) in layout.items():
        slab = slab.at[off:off + r, 0:c].set(raw[name].astype(dtype))
    return slab


def init_params(key):
    ks = iter(jax.random.split(key, 64))

    def nrm(shape, scale=0.05):
        return (scale * jax.random.normal(next(ks), shape)).astype(jnp.float32)

    raw = {}
    raw["w_patch"] = nrm((CPP, VIT_D))                  # conv patch-embed as matmul
    b_patch = nrm((1, VIT_D))
    cls = nrm((1, VIT_D))
    pos = nrm((SEQ, VIT_D))
    # Precombined per-token additive term (padded to SEQ_P rows; pad rows stay zero).
    bias_grid = jnp.zeros((SEQ_P, VIT_D), jnp.float32)
    bias_grid = bias_grid.at[0:1].set(cls + pos[0:1])
    bias_grid = bias_grid.at[1:SEQ].set(pos[1:SEQ] + b_patch)
    raw["bias_grid"] = bias_grid

    for l in range(VIT_LAYERS):
        raw[f"ln1g_{l}"] = jnp.ones((1, VIT_D), jnp.float32)
        raw[f"ln1b_{l}"] = jnp.zeros((1, VIT_D), jnp.float32)
        raw[f"wqkv_{l}"] = nrm((VIT_D, 3 * VIT_D))      # fused Q|K|V projection
        raw[f"bqkv_{l}"] = nrm((1, 3 * VIT_D))
        raw[f"wo_{l}"] = nrm((VIT_D, VIT_D))            # fused attention output projection
        raw[f"bo_{l}"] = nrm((1, VIT_D))
        raw[f"ln2g_{l}"] = jnp.ones((1, VIT_D), jnp.float32)
        raw[f"ln2b_{l}"] = jnp.zeros((1, VIT_D), jnp.float32)
        raw[f"w1_{l}"] = nrm((VIT_D, MLP_D))
        raw[f"b1_{l}"] = nrm((1, MLP_D))
        raw[f"w2_{l}"] = nrm((MLP_D, VIT_D))
        raw[f"b2_{l}"] = nrm((1, VIT_D))

    raw["lnfg"] = jnp.ones((1, VIT_D), jnp.float32)
    raw["lnfb"] = jnp.zeros((1, VIT_D), jnp.float32)
    raw["w_init"] = nrm((VIT_D, RNN_H))
    raw["b_init"] = nrm((1, RNN_H))
    # LSTM: [W_ih; W_hh] stacked on rows; bias = b_ih + b_hh combined; gate columns in
    # (i, f, o, g) order (PyTorch (i, f, g, o) permuted at init).
    raw["w_lstm0"] = nrm((COORD + RNN_H, 4 * RNN_H))
    raw["b_lstm0"] = nrm((1, 4 * RNN_H))
    raw["w_lstm1"] = nrm((2 * RNN_H, 4 * RNN_H))
    raw["b_lstm1"] = nrm((1, 4 * RNN_H))
    # additive attention: attn.weight.T split into decoder / encoder parts; v as row vector
    raw["w_attn_dec"] = nrm((RNN_H, RNN_H))
    raw["w_attn_enc"] = nrm((VIT_D, RNN_H))
    raw["b_attn"] = nrm((1, RNN_H))
    raw["v_attn"] = nrm((1, RNN_H))
    # fc_out: [W_hidden; W_context] stacked on rows
    raw["w_out"] = nrm((RNN_H + VIT_D, COORD))
    raw["b_out"] = nrm((1, COORD))

    wb = _pack(raw, BF_LAYOUT, BF_ROWS, jnp.bfloat16)   # ViT weights pre-cast to bf16
    wf = _pack(raw, F32_LAYOUT, F32_ROWS, jnp.float32)  # LN/bias/decoder params in f32
    return wb, wf


# ---------------- full forward pass -----------------------------------------------------
def forward(wb, wf, image, first_coord):
    bsz = image.shape[0]
    # im2col layout glue (pure data movement), padded to SEQ_P=8 token rows:
    # row 0 = CLS (zero; bias_grid supplies cls+pos), rows 1..4 = patches, rows 5..7 = pad.
    p = image.reshape(bsz, C, GRID, PATCH, GRID, PATCH)
    p = p.transpose(0, 2, 4, 1, 3, 5).reshape(bsz, NUM_PATCHES, CPP)
    patches = jnp.zeros((bsz, SEQ_P, CPP), jnp.float32).at[:, 1:SEQ, :].set(p)
    coord0 = first_coord.reshape(bsz, 1, COORD)
    return fused_forward(patches, coord0, wb, wf)        # (B, STEPS, COORD)


if __name__ == "__main__":
    key = jax.random.PRNGKey(0)
    k_img, k_coord, k_params = jax.random.split(key, 3)
    image_pixel_values = jax.random.normal(k_img, (B, C, IMG, IMG), dtype=jnp.float32)
    first_coord_input = jax.random.normal(k_coord, (B, COORD), dtype=jnp.float32)
    wb, wf = init_params(k_params)

    out = jax.jit(forward)(wb, wf, image_pixel_values, first_coord_input)
    out = jax.block_until_ready(out)
    assert out.shape == (B, NUM_POINTS - 1, COORD), out.shape
    assert bool(jnp.all(jnp.isfinite(out)))
    print("KERNEL_OK")
</pallas_src>

<mosaic_0001>
module attributes {stable_mosaic.version = 11 : i64} {
  func.func @fused_forward_kernel(%arg0: i32, %arg1: memref<1x8x192xf32, #tpu.memory_space<vmem>>, %arg2: memref<1x1x2xf32, #tpu.memory_space<vmem>>, %arg3: memref<640x128xbf16, #tpu.memory_space<vmem>>, %arg4: memref<384x128xf32, #tpu.memory_space<vmem>>, %arg5: memref<1x3x2xf32, #tpu.memory_space<vmem>>) attributes {dimension_semantics = [#tpu.dimension_semantics<parallel>], iteration_bounds = array<i64: 2>, scalar_prefetch = 0 : i64, scratch_operands = 0 : i64, tpu.core_type = #tpu.core_type<tc>, window_params = [{transform_indices = @transform_0, window_bounds = array<i64: 1, 8, 192>}, {transform_indices = @transform_1, window_bounds = array<i64: 1, 1, 2>}, {pipeline_mode = #tpu.pipeline_mode<synchronous>, transform_indices = @transform_2, window_bounds = array<i64: 640, 128>}, {pipeline_mode = #tpu.pipeline_mode<synchronous>, transform_indices = @transform_3, window_bounds = array<i64: 384, 128>}, {transform_indices = @transform_4, window_bounds = array<i64: 1, 3, 2>}]} {
    %0 = tpu.iota {dimensions = array<i32: 2>} : vector<1x1x8xi32>
    %c5_i32 = arith.constant 5 : i32
    %1 = vector.broadcast %c5_i32 : i32 to vector<1x1x8xi32>
    %2 = arith.cmpi slt, %0, %1 : vector<1x1x8xi32>
    %3 = tpu.iota {dimensions = array<i32: 0>} : vector<8x1xi32>
    %c5_i32_0 = arith.constant 5 : i32
    %4 = vector.broadcast %c5_i32_0 : i32 to vector<8x1xi32>
    %5 = arith.cmpi slt, %3, %4 : vector<8x1xi32>
    %6 = arith.extui %5 : vector<8x1xi1> to vector<8x1xi32>
    %7 = arith.sitofp %6 : vector<8x1xi32> to vector<8x1xf32>
    %c0 = arith.constant 0 : index
    %c0_1 = arith.constant 0 : index
    %c0_2 = arith.constant 0 : index
    %8 = vector.load %arg1[%c0, %c0_1, %c0_2] : memref<1x8x192xf32, #tpu.memory_space<vmem>>, vector<1x8x192xf32>
    %9 = vector.shape_cast %8 : vector<1x8x192xf32> to vector<8x192xf32>
    %c0_3 = arith.constant 0 : index
    %c0_4 = arith.constant 0 : index
    %10 = vector.load %arg3[%c0_3, %c0_4] : memref<640x128xbf16, #tpu.memory_space<vmem>>, vector<192x32xbf16>
    %11 = arith.truncf %9 : vector<8x192xf32> to vector<8x192xbf16>
    %cst = arith.constant dense<0.000000e+00> : vector<8x32xf32>
    %12 = tpu.matmul %11, %10, %cst {dimension_numbers = #tpu.dot_dimension_numbers<[1], [0], [0], [1], [0, 0, 1, 1], [], []>} : vector<8x192xbf16>, vector<192x32xbf16>, vector<8x32xf32> -> vector<8x32xf32>
    %c0_5 = arith.constant 0 : index
    %c0_6 = arith.constant 0 : index
    %13 = vector.load %arg4[%c0_5, %c0_6] : memref<384x128xf32, #tpu.memory_space<vmem>>, vector<8x32xf32>
    %14 = arith.addf %12, %13 : vector<8x32xf32>
    %c8 = arith.constant 8 : index
    %c0_7 = arith.constant 0 : index
    %15 = vector.load %arg4[%c8, %c0_7] : memref<384x128xf32, #tpu.memory_space<vmem>>, vector<1x32xf32>
    %c16 = arith.constant 16 : index
    %c0_8 = arith.constant 0 : index
    %16 = vector.load %arg4[%c16, %c0_8] : memref<384x128xf32, #tpu.memory_space<vmem>>, vector<1x32xf32>
    %cst_9 = arith.constant dense<0.000000e+00> : vector<8xf32>
    %17 = vector.multi_reduction <add>, %14, %cst_9 [1] : vector<8x32xf32> to vector<8xf32>
    %18 = vector.shape_cast %17 : vector<8xf32> to vector<8x1xf32>
    %cst_10 = arith.constant 3.200000e+01 : f32
    %19 = vector.broadcast %cst_10 : f32 to vector<8x1xf32>
    %20 = arith.divf %18, %19 : vector<8x1xf32>
    %21 = vector.broadcast %20 : vector<8x1xf32> to vector<8x32xf32>
    %22 = arith.subf %14, %21 : vector<8x32xf32>
    %23 = arith.mulf %22, %22 : vector<8x32xf32>
    %cst_11 = arith.constant dense<0.000000e+00> : vector<8xf32>
    %24 = vector.multi_reduction <add>, %23, %cst_11 [1] : vector<8x32xf32> to vector<8xf32>
    %25 = vector.shape_cast %24 : vector<8xf32> to vector<8x1xf32>
    %cst_12 = arith.constant 3.200000e+01 : f32
    %26 = vector.broadcast %cst_12 : f32 to vector<8x1xf32>
    %27 = arith.divf %25, %26 : vector<8x1xf32>
    %28 = vector.broadcast %20 : vector<8x1xf32> to vector<8x32xf32>
    %29 = arith.subf %14, %28 : vector<8x32xf32>
    %cst_13 = arith.constant 9.99999996E-13 : f32
    %30 = vector.broadcast %cst_13 : f32 to vector<8x1xf32>
    %31 = arith.addf %27, %30 : vector<8x1xf32>
    %32 = math.rsqrt %31 : vector<8x1xf32>
    %33 = vector.broadcast %32 : vector<8x1xf32> to vector<8x32xf32>
    %34 = arith.mulf %29, %33 : vector<8x32xf32>
    %35 = vector.broadcast %15 : vector<1x32xf32> to vector<8x32xf32>
    %36 = arith.mulf %34, %35 : vector<8x32xf32>
    %37 = vector.broadcast %16 : vector<1x32xf32> to vector<8x32xf32>
    %38 = arith.addf %36, %37 : vector<8x32xf32>
    %c192 = arith.constant 192 : index
    %c0_14 = arith.constant 0 : index
    %39 = vector.load %arg3[%c192, %c0_14] : memref<640x128xbf16, #tpu.memory_space<vmem>>, vector<32x96xbf16>
    %40 = arith.truncf %38 : vector<8x32xf32> to vector<8x32xbf16>
    %cst_15 = arith.constant dense<0.000000e+00> : vector<8x96xf32>
    %41 = tpu.matmul %40, %39, %cst_15 {dimension_numbers = #tpu.dot_dimension_numbers<[1], [0], [0], [1], [0, 0, 1, 1], [], []>} : vector<8x32xbf16>, vector<32x96xbf16>, vector<8x96xf32> -> vector<8x96xf32>
    %c24 = arith.constant 24 : index
    %c0_16 = arith.constant 0 : index
    %42 = vector.load %arg4[%c24, %c0_16] : memref<384x128xf32, #tpu.memory_space<vmem>>, vector<1x96xf32>
    %43 = vector.broadcast %42 : vector<1x96xf32> to vector<8x96xf32>
    %44 = arith.addf %41, %43 : vector<8x96xf32>
    %45 = vector.extract_strided_slice %44 {offsets = [0, 0], sizes = [8, 32], strides = [1, 1]} : vector<8x96xf32> to vector<8x32xf32>
    %46 = vector.extract_strided_slice %45 {offsets = [0, 0], sizes = [8, 16], strides = [1, 1]} : vector<8x32xf32> to vector<8x16xf32>
    %47 = vector.extract_strided_slice %45 {offsets = [0, 16], sizes = [8, 16], strides = [1, 1]} : vector<8x32xf32> to vector<8x16xf32>
    %48 = vector.shape_cast %46 : vector<8x16xf32> to vector<1x8x16xf32>
    %49 = vector.shape_cast %47 : vector<8x16xf32> to vector<1x8x16xf32>
    %50 = tpu.concatenate %48, %49 in 0 : vector<1x8x16xf32>, vector<1x8x16xf32> -> vector<2x8x16xf32>
    %51 = vector.extract_strided_slice %44 {offsets = [0, 32], sizes = [8, 32], strides = [1, 1]} : vector<8x96xf32> to vector<8x32xf32>
    %52 = vector.extract_strided_slice %51 {offsets = [0, 0], sizes = [8, 16], strides = [1, 1]} : vector<8x32xf32> to vector<8x16xf32>
    %53 = vector.extract_strided_slice %51 {offsets = [0, 16], sizes = [8, 16], strides = [1, 1]} : vector<8x32xf32> to vector<8x16xf32>
    %54 = vector.shape_cast %52 : vector<8x16xf32> to vector<1x8x16xf32>
    %55 = vector.shape_cast %53 : vector<8x16xf32> to vector<1x8x16xf32>
    %56 = tpu.concatenate %54, %55 in 0 : vector<1x8x16xf32>, vector<1x8x16xf32> -> vector<2x8x16xf32>
    %57 = vector.extract_strided_slice %44 {offsets = [0, 64], sizes = [8, 32], strides = [1, 1]} : vector<8x96xf32> to vector<8x32xf32>
    %58 = vector.extract_strided_slice %57 {offsets = [0, 0], sizes = [8, 16], strides = [1, 1]} : vector<8x32xf32> to vector<8x16xf32>
    %59 = vector.extract_strided_slice %57 {offsets = [0, 16], sizes = [8, 16], strides = [1, 1]} : vector<8x32xf32> to vector<8x16xf32>
    %60 = vector.shape_cast %58 : vector<8x16xf32> to vector<1x8x16xf32>
    %61 = vector.shape_cast %59 : vector<8x16xf32> to vector<1x8x16xf32>
    %62 = tpu.concatenate %60, %61 in 0 : vector<1x8x16xf32>, vector<1x8x16xf32> -> vector<2x8x16xf32>
    "tpu.trace_start"() <{level = 10 : i32, message = "hqd,hkd->hqk"}> : () -> ()
    %cst_17 = arith.constant dense<0.000000e+00> : vector<2x8x8xf32>
    %63 = tpu.matmul %50, %56, %cst_17 {dimension_numbers = #tpu.dot_dimension_numbers<[2], [2], [1], [1], [0, 0, 0, 1, 1, 1], [0], [0]>} : vector<2x8x16xf32>, vector<2x8x16xf32>, vector<2x8x8xf32> -> vector<2x8x8xf32>
    "tpu.trace_stop"() : () -> ()
    %cst_18 = arith.constant 2.500000e-01 : f32
    %64 = vector.broadcast %cst_18 : f32 to vector<2x8x8xf32>
    %65 = arith.mulf %63, %64 : vector<2x8x8xf32>
    %cst_19 = arith.constant -1.000000e+30 : f32
    %66 = vector.shape_cast %2 : vector<1x1x8xi1> to vector<1x1x8xi1>
    %67 = vector.broadcast %66 : vector<1x1x8xi1> to vector<2x8x8xi1>
    %68 = vector.broadcast %cst_19 : f32 to vector<2x8x8xf32>
    %69 = arith.select %67, %65, %68 : vector<2x8x8xi1>, vector<2x8x8xf32>
    %cst_20 = arith.constant dense<0xFF800000> : vector<2x8xf32>
    %70 = vector.multi_reduction <maximumf>, %69, %cst_20 [2] : vector<2x8x8xf32> to vector<2x8xf32>
    %cst_21 = arith.constant 0xFF800000 : f32
    %71 = vector.broadcast %cst_21 : f32 to vector<2x8xf32>
    %72 = arith.maximumf %71, %70 : vector<2x8xf32>
    %73 = vector.shape_cast %72 : vector<2x8xf32> to vector<2x8x1xf32>
    %74 = vector.broadcast %73 : vector<2x8x1xf32> to vector<2x8x8xf32>
    %75 = arith.subf %69, %74 : vector<2x8x8xf32>
    %76 = math.exp %75 : vector<2x8x8xf32>
    %cst_22 = arith.constant dense<0.000000e+00> : vector<2x8xf32>
    %77 = vector.multi_reduction <add>, %76, %cst_22 [2] : vector<2x8x8xf32> to vector<2x8xf32>
    %78 = vector.shape_cast %77 : vector<2x8xf32> to vector<2x8x1xf32>
    %79 = vector.broadcast %78 : vector<2x8x1xf32> to vector<2x8x8xf32>
    %80 = arith.divf %76, %79 : vector<2x8x8xf32>
    "tpu.trace_start"() <{level = 10 : i32, message = "hqk,hkd->hqd"}> : () -> ()
    %cst_23 = arith.constant dense<0.000000e+00> : vector<2x8x16xf32>
    %81 = tpu.matmul %80, %62, %cst_23 {dimension_numbers = #tpu.dot_dimension_numbers<[2], [1], [1], [2], [0, 0, 0, 1, 1, 2], [0], [0]>} : vector<2x8x8xf32>, vector<2x8x16xf32>, vector<2x8x16xf32> -> vector<2x8x16xf32>
    "tpu.trace_stop"() : () -> ()
    %82 = vector.extract_strided_slice %81 {offsets = [0, 0, 0], sizes = [1, 8, 16], strides = [1, 1, 1]} : vector<2x8x16xf32> to vector<1x8x16xf32>
    %83 = vector.shape_cast %82 : vector<1x8x16xf32> to vector<8x16xf32>
    %84 = vector.extract_strided_slice %81 {offsets = [1, 0, 0], sizes = [1, 8, 16], strides = [1, 1, 1]} : vector<2x8x16xf32> to vector<1x8x16xf32>
    %85 = vector.shape_cast %84 : vector<1x8x16xf32> to vector<8x16xf32>
    %86 = tpu.concatenate %83, %85 in 1 : vector<8x16xf32>, vector<8x16xf32> -> vector<8x32xf32>
    %c224 = arith.constant 224 : index
    %c0_24 = arith.constant 0 : index
    %87 = vector.load %arg3[%c224, %c0_24] : memref<640x128xbf16, #tpu.memory_space<vmem>>, vector<32x32xbf16>
    %88 = arith.truncf %86 : vector<8x32xf32> to vector<8x32xbf16>
    %cst_25 = arith.constant dense<0.000000e+00> : vector<8x32xf32>
    %89 = tpu.matmul %88, %87, %cst_25 {dimension_numbers = #tpu.dot_dimension_numbers<[1], [0], [0], [1], [0, 0, 1, 1], [], []>} : vector<8x32xbf16>, vector<32x32xbf16>, vector<8x32xf32> -> vector<8x32xf32>
    %90 = arith.addf %14, %89 : vector<8x32xf32>
    %c32 = arith.constant 32 : index
    %c0_26 = arith.constant 0 : index
    %91 = vector.load %arg4[%c32, %c0_26] : memref<384x128xf32, #tpu.memory_space<vmem>>, vector<1x32xf32>
    %92 = vector.broadcast %91 : vector<1x32xf32> to vector<8x32xf32>
    %93 = arith.addf %90, %92 : vector<8x32xf32>
    %c40 = arith.constant 40 : index
    %c0_27 = arith.constant 0 : index
    %94 = vector.load %arg4[%c40, %c0_27] : memref<384x128xf32, #tpu.memory_space<vmem>>, vector<1x32xf32>
    %c48 = arith.constant 48 : index
    %c0_28 = arith.constant 0 : index
    %95 = vector.load %arg4[%c48, %c0_28] : memref<384x128xf32, #tpu.memory_space<vmem>>, vector<1x32xf32>
    %cst_29 = arith.constant dense<0.000000e+00> : vector<8xf32>
    %96 = vector.multi_reduction <add>, %93, %cst_29 [1] : vector<8x32xf32> to vector<8xf32>
    %97 = vector.shape_cast %96 : vector<8xf32> to vector<8x1xf32>
    %cst_30 = arith.constant 3.200000e+01 : f32
    %98 = vector.broadcast %cst_30 : f32 to vector<8x1xf32>
    %99 = arith.divf %97, %98 : vector<8x1xf32>
    %100 = vector.broadcast %99 : vector<8x1xf32> to vector<8x32xf32>
    %101 = arith.subf %93, %100 : vector<8x32xf32>
    %102 = arith.mulf %101, %101 : vector<8x32xf32>
    %cst_31 = arith.constant dense<0.000000e+00> : vector<8xf32>
    %103 = vector.multi_reduction <add>, %102, %cst_31 [1] : vector<8x32xf32> to vector<8xf32>
    %104 = vector.shape_cast %103 : vector<8xf32> to vector<8x1xf32>
    %cst_32 = arith.constant 3.200000e+01 : f32
    %105 = vector.broadcast %cst_32 : f32 to vector<8x1xf32>
    %106 = arith.divf %104, %105 : vector<8x1xf32>
    %107 = vector.broadcast %99 : vector<8x1xf32> to vector<8x32xf32>
    %108 = arith.subf %93, %107 : vector<8x32xf32>
    %cst_33 = arith.constant 9.99999996E-13 : f32
    %109 = vector.broadcast %cst_33 : f32 to vector<8x1xf32>
    %110 = arith.addf %106, %109 : vector<8x1xf32>
    %111 = math.rsqrt %110 : vector<8x1xf32>
    %112 = vector.broadcast %111 : vector<8x1xf32> to vector<8x32xf32>
    %113 = arith.mulf %108, %112 : vector<8x32xf32>
    %114 = vector.broadcast %94 : vector<1x32xf32> to vector<8x32xf32>
    %115 = arith.mulf %113, %114 : vector<8x32xf32>
    %116 = vector.broadcast %95 : vector<1x32xf32> to vector<8x32xf32>
    %117 = arith.addf %115, %116 : vector<8x32xf32>
    %c256 = arith.constant 256 : index
    %c0_34 = arith.constant 0 : index
    %118 = vector.load %arg3[%c256, %c0_34] : memref<640x128xbf16, #tpu.memory_space<vmem>>, vector<32x128xbf16>
    %119 = arith.truncf %117 : vector<8x32xf32> to vector<8x32xbf16>
    %cst_35 = arith.constant dense<0.000000e+00> : vector<8x128xf32>
    %120 = tpu.matmul %119, %118, %cst_35 {dimension_numbers = #tpu.dot_dimension_numbers<[1], [0], [0], [1], [0, 0, 1, 1], [], []>} : vector<8x32xbf16>, vector<32x128xbf16>, vector<8x128xf32> -> vector<8x128xf32>
    %c56 = arith.constant 56 : index
    %c0_36 = arith.constant 0 : index
    %121 = vector.load %arg4[%c56, %c0_36] : memref<384x128xf32, #tpu.memory_space<vmem>>, vector<1x128xf32>
    %122 = vector.broadcast %121 : vector<1x128xf32> to vector<8x128xf32>
    %123 = arith.addf %120, %122 : vector<8x128xf32>
    %124 = arith.mulf %123, %123 : vector<8x128xf32>
    %125 = arith.mulf %123, %124 : vector<8x128xf32>
    %cst_37 = arith.constant 4.471500e-02 : f32
    %126 = vector.broadcast %cst_37 : f32 to vector<8x128xf32>
    %127 = arith.mulf %126, %125 : vector<8x128xf32>
    %128 = arith.addf %123, %127 : vector<8x128xf32>
    %cst_38 = arith.constant 0.797884583 : f32
    %129 = vector.broadcast %cst_38 : f32 to vector<8x128xf32>
    %130 = arith.mulf %129, %128 : vector<8x128xf32>
    %131 = math.tanh %130 : vector<8x128xf32>
    %cst_39 = arith.constant 1.000000e+00 : f32
    %132 = vector.broadcast %cst_39 : f32 to vector<8x128xf32>
    %133 = arith.addf %132, %131 : vector<8x128xf32>
    %cst_40 = arith.constant 5.000000e-01 : f32
    %134 = vector.broadcast %cst_40 : f32 to vector<8x128xf32>
    %135 = arith.mulf %134, %133 : vector<8x128xf32>
    %136 = arith.mulf %123, %135 : vector<8x128xf32>
    %c288 = arith.constant 288 : index
    %c0_41 = arith.constant 0 : index
    %137 = vector.load %arg3[%c288, %c0_41] : memref<640x128xbf16, #tpu.memory_space<vmem>>, vector<128x32xbf16>
    %138 = arith.truncf %136 : vector<8x128xf32> to vector<8x128xbf16>
    %cst_42 = arith.constant dense<0.000000e+00> : vector<8x32xf32>
    %139 = tpu.matmul %138, %137, %cst_42 {dimension_numbers = #tpu.dot_dimension_numbers<[1], [0], [0], [1], [0, 0, 1, 1], [], []>} : vector<8x128xbf16>, vector<128x32xbf16>, vector<8x32xf32> -> vector<8x32xf32>
    %140 = arith.addf %93, %139 : vector<8x32xf32>
    %c64 = arith.constant 64 : index
    %c0_43 = arith.constant 0 : index
    %141 = vector.load %arg4[%c64, %c0_43] : memref<384x128xf32, #tpu.memory_space<vmem>>, vector<1x32xf32>
    %142 = vector.broadcast %141 : vector<1x32xf32> to vector<8x32xf32>
    %143 = arith.addf %140, %142 : vector<8x32xf32>
    %c72 = arith.constant 72 : index
    %c0_44 = arith.constant 0 : index
    %144 = vector.load %arg4[%c72, %c0_44] : memref<384x128xf32, #tpu.memory_space<vmem>>, vector<1x32xf32>
    %c80 = arith.constant 80 : index
    %c0_45 = arith.constant 0 : index
    %145 = vector.load %arg4[%c80, %c0_45] : memref<384x128xf32, #tpu.memory_space<vmem>>, vector<1x32xf32>
    %cst_46 = arith.constant dense<0.000000e+00> : vector<8xf32>
    %146 = vector.multi_reduction <add>, %143, %cst_46 [1] : vector<8x32xf32> to vector<8xf32>
    %147 = vector.shape_cast %146 : vector<8xf32> to vector<8x1xf32>
    %cst_47 = arith.constant 3.200000e+01 : f32
    %148 = vector.broadcast %cst_47 : f32 to vector<8x1xf32>
    %149 = arith.divf %147, %148 : vector<8x1xf32>
    %150 = vector.broadcast %149 : vector<8x1xf32> to vector<8x32xf32>
    %151 = arith.subf %143, %150 : vector<8x32xf32>
    %152 = arith.mulf %151, %151 : vector<8x32xf32>
    %cst_48 = arith.constant dense<0.000000e+00> : vector<8xf32>
    %153 = vector.multi_reduction <add>, %152, %cst_48 [1] : vector<8x32xf32> to vector<8xf32>
    %154 = vector.shape_cast %153 : vector<8xf32> to vector<8x1xf32>
    %cst_49 = arith.constant 3.200000e+01 : f32
    %155 = vector.broadcast %cst_49 : f32 to vector<8x1xf32>
    %156 = arith.divf %154, %155 : vector<8x1xf32>
    %157 = vector.broadcast %149 : vector<8x1xf32> to vector<8x32xf32>
    %158 = arith.subf %143, %157 : vector<8x32xf32>
    %cst_50 = arith.constant 9.99999996E-13 : f32
    %159 = vector.broadcast %cst_50 : f32 to vector<8x1xf32>
    %160 = arith.addf %156, %159 : vector<8x1xf32>
    %161 = math.rsqrt %160 : vector<8x1xf32>
    %162 = vector.broadcast %161 : vector<8x1xf32> to vector<8x32xf32>
    %163 = arith.mulf %158, %162 : vector<8x32xf32>
    %164 = vector.broadcast %144 : vector<1x32xf32> to vector<8x32xf32>
    %165 = arith.mulf %163, %164 : vector<8x32xf32>
    %166 = vector.broadcast %145 : vector<1x32xf32> to vector<8x32xf32>
    %167 = arith.addf %165, %166 : vector<8x32xf32>
    %c416 = arith.constant 416 : index
    %c0_51 = arith.constant 0 : index
    %168 = vector.load %arg3[%c416, %c0_51] : memref<640x128xbf16, #tpu.memory_space<vmem>>, vector<32x96xbf16>
    %169 = arith.truncf %167 : vector<8x32xf32> to vector<8x32xbf16>
    %cst_52 = arith.constant dense<0.000000e+00> : vector<8x96xf32>
    %170 = tpu.matmul %169, %168, %cst_52 {dimension_numbers = #tpu.dot_dimension_numbers<[1], [0], [0], [1], [0, 0, 1, 1], [], []>} : vector<8x32xbf16>, vector<32x96xbf16>, vector<8x96xf32> -> vector<8x96xf32>
    %c88 = arith.constant 88 : index
    %c0_53 = arith.constant 0 : index
    %171 = vector.load %arg4[%c88, %c0_53] : memref<384x128xf32, #tpu.memory_space<vmem>>, vector<1x96xf32>
    %172 = vector.broadcast %171 : vector<1x96xf32> to vector<8x96xf32>
    %173 = arith.addf %170, %172 : vector<8x96xf32>
    %174 = vector.extract_strided_slice %173 {offsets = [0, 0], sizes = [8, 32], strides = [1, 1]} : vector<8x96xf32> to vector<8x32xf32>
    %175 = vector.extract_strided_slice %174 {offsets = [0, 0], sizes = [8, 16], strides = [1, 1]} : vector<8x32xf32> to vector<8x16xf32>
    %176 = vector.extract_strided_slice %174 {offsets = [0, 16], sizes = [8, 16], strides = [1, 1]} : vector<8x32xf32> to vector<8x16xf32>
    %177 = vector.shape_cast %175 : vector<8x16xf32> to vector<1x8x16xf32>
    %178 = vector.shape_cast %176 : vector<8x16xf32> to vector<1x8x16xf32>
    %179 = tpu.concatenate %177, %178 in 0 : vector<1x8x16xf32>, vector<1x8x16xf32> -> vector<2x8x16xf32>
    %180 = vector.extract_strided_slice %173 {offsets = [0, 32], sizes = [8, 32], strides = [1, 1]} : vector<8x96xf32> to vector<8x32xf32>
    %181 = vector.extract_strided_slice %180 {offsets = [0, 0], sizes = [8, 16], strides = [1, 1]} : vector<8x32xf32> to vector<8x16xf32>
    %182 = vector.extract_strided_slice %180 {offsets = [0, 16], sizes = [8, 16], strides = [1, 1]} : vector<8x32xf32> to vector<8x16xf32>
    %183 = vector.shape_cast %181 : vector<8x16xf32> to vector<1x8x16xf32>
    %184 = vector.shape_cast %182 : vector<8x16xf32> to vector<1x8x16xf32>
    %185 = tpu.concatenate %183, %184 in 0 : vector<1x8x16xf32>, vector<1x8x16xf32> -> vector<2x8x16xf32>
    %186 = vector.extract_strided_slice %173 {offsets = [0, 64], sizes = [8, 32], strides = [1, 1]} : vector<8x96xf32> to vector<8x32xf32>
    %187 = vector.extract_strided_slice %186 {offsets = [0, 0], sizes = [8, 16], strides = [1, 1]} : vector<8x32xf32> to vector<8x16xf32>
    %188 = vector.extract_strided_slice %186 {offsets = [0, 16], sizes = [8, 16], strides = [1, 1]} : vector<8x32xf32> to vector<8x16xf32>
    %189 = vector.shape_cast %187 : vector<8x16xf32> to vector<1x8x16xf32>
    %190 = vector.shape_cast %188 : vector<8x16xf32> to vector<1x8x16xf32>
    %191 = tpu.concatenate %189, %190 in 0 : vector<1x8x16xf32>, vector<1x8x16xf32> -> vector<2x8x16xf32>
    "tpu.trace_start"() <{level = 10 : i32, message = "hqd,hkd->hqk"}> : () -> ()
    %cst_54 = arith.constant dense<0.000000e+00> : vector<2x8x8xf32>
    %192 = tpu.matmul %179, %185, %cst_54 {dimension_numbers = #tpu.dot_dimension_numbers<[2], [2], [1], [1], [0, 0, 0, 1, 1, 1], [0], [0]>} : vector<2x8x16xf32>, vector<2x8x16xf32>, vector<2x8x8xf32> -> vector<2x8x8xf32>
    "tpu.trace_stop"() : () -> ()
    %cst_55 = arith.constant 2.500000e-01 : f32
    %193 = vector.broadcast %cst_55 : f32 to vector<2x8x8xf32>
    %194 = arith.mulf %192, %193 : vector<2x8x8xf32>
    %cst_56 = arith.constant -1.000000e+30 : f32
    %195 = vector.shape_cast %2 : vector<1x1x8xi1> to vector<1x1x8xi1>
    %196 = vector.broadcast %195 : vector<1x1x8xi1> to vector<2x8x8xi1>
    %197 = vector.broadcast %cst_56 : f32 to vector<2x8x8xf32>
    %198 = arith.select %196, %194, %197 : vector<2x8x8xi1>, vector<2x8x8xf32>
    %cst_57 = arith.constant dense<0xFF800000> : vector<2x8xf32>
    %199 = vector.multi_reduction <maximumf>, %198, %cst_57 [2] : vector<2x8x8xf32> to vector<2x8xf32>
    %cst_58 = arith.constant 0xFF800000 : f32
    %200 = vector.broadcast %cst_58 : f32 to vector<2x8xf32>
    %201 = arith.maximumf %200, %199 : vector<2x8xf32>
    %202 = vector.shape_cast %201 : vector<2x8xf32> to vector<2x8x1xf32>
    %203 = vector.broadcast %202 : vector<2x8x1xf32> to vector<2x8x8xf32>
    %204 = arith.subf %198, %203 : vector<2x8x8xf32>
    %205 = math.exp %204 : vector<2x8x8xf32>
    %cst_59 = arith.constant dense<0.000000e+00> : vector<2x8xf32>
    %206 = vector.multi_reduction <add>, %205, %cst_59 [2] : vector<2x8x8xf32> to vector<2x8xf32>
    %207 = vector.shape_cast %206 : vector<2x8xf32> to vector<2x8x1xf32>
    %208 = vector.broadcast %207 : vector<2x8x1xf32> to vector<2x8x8xf32>
    %209 = arith.divf %205, %208 : vector<2x8x8xf32>
    "tpu.trace_start"() <{level = 10 : i32, message = "hqk,hkd->hqd"}> : () -> ()
    %cst_60 = arith.constant dense<0.000000e+00> : vector<2x8x16xf32>
    %210 = tpu.matmul %209, %191, %cst_60 {dimension_numbers = #tpu.dot_dimension_numbers<[2], [1], [1], [2], [0, 0, 0, 1, 1, 2], [0], [0]>} : vector<2x8x8xf32>, vector<2x8x16xf32>, vector<2x8x16xf32> -> vector<2x8x16xf32>
    "tpu.trace_stop"() : () -> ()
    %211 = vector.extract_strided_slice %210 {offsets = [0, 0, 0], sizes = [1, 8, 16], strides = [1, 1, 1]} : vector<2x8x16xf32> to vector<1x8x16xf32>
    %212 = vector.shape_cast %211 : vector<1x8x16xf32> to vector<8x16xf32>
    %213 = vector.extract_strided_slice %210 {offsets = [1, 0, 0], sizes = [1, 8, 16], strides = [1, 1, 1]} : vector<2x8x16xf32> to vector<1x8x16xf32>
    %214 = vector.shape_cast %213 : vector<1x8x16xf32> to vector<8x16xf32>
    %215 = tpu.concatenate %212, %214 in 1 : vector<8x16xf32>, vector<8x16xf32> -> vector<8x32xf32>
    %c448 = arith.constant 448 : index
    %c0_61 = arith.constant 0 : index
    %216 = vector.load %arg3[%c448, %c0_61] : memref<640x128xbf16, #tpu.memory_space<vmem>>, vector<32x32xbf16>
    %217 = arith.truncf %215 : vector<8x32xf32> to vector<8x32xbf16>
    %cst_62 = arith.constant dense<0.000000e+00> : vector<8x32xf32>
    %218 = tpu.matmul %217, %216, %cst_62 {dimension_numbers = #tpu.dot_dimension_numbers<[1], [0], [0], [1], [0, 0, 1, 1], [], []>} : vector<8x32xbf16>, vector<32x32xbf16>, vector<8x32xf32> -> vector<8x32xf32>
    %219 = arith.addf %143, %218 : vector<8x32xf32>
    %c96 = arith.constant 96 : index
    %c0_63 = arith.constant 0 : index
    %220 = vector.load %arg4[%c96, %c0_63] : memref<384x128xf32, #tpu.memory_space<vmem>>, vector<1x32xf32>
    %221 = vector.broadcast %220 : vector<1x32xf32> to vector<8x32xf32>
    %222 = arith.addf %219, %221 : vector<8x32xf32>
    %c104 = arith.constant 104 : index
    %c0_64 = arith.constant 0 : index
    %223 = vector.load %arg4[%c104, %c0_64] : memref<384x128xf32, #tpu.memory_space<vmem>>, vector<1x32xf32>
    %c112 = arith.constant 112 : index
    %c0_65 = arith.constant 0 : index
    %224 = vector.load %arg4[%c112, %c0_65] : memref<384x128xf32, #tpu.memory_space<vmem>>, vector<1x32xf32>
    %cst_66 = arith.constant dense<0.000000e+00> : vector<8xf32>
    %225 = vector.multi_reduction <add>, %222, %cst_66 [1] : vector<8x32xf32> to vector<8xf32>
    %226 = vector.shape_cast %225 : vector<8xf32> to vector<8x1xf32>
    %cst_67 = arith.constant 3.200000e+01 : f32
    %227 = vector.broadcast %cst_67 : f32 to vector<8x1xf32>
    %228 = arith.divf %226, %227 : vector<8x1xf32>
    %229 = vector.broadcast %228 : vector<8x1xf32> to vector<8x32xf32>
    %230 = arith.subf %222, %229 : vector<8x32xf32>
    %231 = arith.mulf %230, %230 : vector<8x32xf32>
    %cst_68 = arith.constant dense<0.000000e+00> : vector<8xf32>
    %232 = vector.multi_reduction <add>, %231, %cst_68 [1] : vector<8x32xf32> to vector<8xf32>
    %233 = vector.shape_cast %232 : vector<8xf32> to vector<8x1xf32>
    %cst_69 = arith.constant 3.200000e+01 : f32
    %234 = vector.broadcast %cst_69 : f32 to vector<8x1xf32>
    %235 = arith.divf %233, %234 : vector<8x1xf32>
    %236 = vector.broadcast %228 : vector<8x1xf32> to vector<8x32xf32>
    %237 = arith.subf %222, %236 : vector<8x32xf32>
    %cst_70 = arith.constant 9.99999996E-13 : f32
    %238 = vector.broadcast %cst_70 : f32 to vector<8x1xf32>
    %239 = arith.addf %235, %238 : vector<8x1xf32>
    %240 = math.rsqrt %239 : vector<8x1xf32>
    %241 = vector.broadcast %240 : vector<8x1xf32> to vector<8x32xf32>
    %242 = arith.mulf %237, %241 : vector<8x32xf32>
    %243 = vector.broadcast %223 : vector<1x32xf32> to vector<8x32xf32>
    %244 = arith.mulf %242, %243 : vector<8x32xf32>
    %245 = vector.broadcast %224 : vector<1x32xf32> to vector<8x32xf32>
    %246 = arith.addf %244, %245 : vector<8x32xf32>
    %c480 = arith.constant 480 : index
    %c0_71 = arith.constant 0 : index
    %247 = vector.load %arg3[%c480, %c0_71] : memref<640x128xbf16, #tpu.memory_space<vmem>>, vector<32x128xbf16>
    %248 = arith.truncf %246 : vector<8x32xf32> to vector<8x32xbf16>
    %cst_72 = arith.constant dense<0.000000e+00> : vector<8x128xf32>
    %249 = tpu.matmul %248, %247, %cst_72 {dimension_numbers = #tpu.dot_dimension_numbers<[1], [0], [0], [1], [0, 0, 1, 1], [], []>} : vector<8x32xbf16>, vector<32x128xbf16>, vector<8x128xf32> -> vector<8x128xf32>
    %c120 = arith.constant 120 : index
    %c0_73 = arith.constant 0 : index
    %250 = vector.load %arg4[%c120, %c0_73] : memref<384x128xf32, #tpu.memory_space<vmem>>, vector<1x128xf32>
    %251 = vector.broadcast %250 : vector<1x128xf32> to vector<8x128xf32>
    %252 = arith.addf %249, %251 : vector<8x128xf32>
    %253 = arith.mulf %252, %252 : vector<8x128xf32>
    %254 = arith.mulf %252, %253 : vector<8x128xf32>
    %cst_74 = arith.constant 4.471500e-02 : f32
    %255 = vector.broadcast %cst_74 : f32 to vector<8x128xf32>
    %256 = arith.mulf %255, %254 : vector<8x128xf32>
    %257 = arith.addf %252, %256 : vector<8x128xf32>
    %cst_75 = arith.constant 0.797884583 : f32
    %258 = vector.broadcast %cst_75 : f32 to vector<8x128xf32>
    %259 = arith.mulf %258, %257 : vector<8x128xf32>
    %260 = math.tanh %259 : vector<8x128xf32>
    %cst_76 = arith.constant 1.000000e+00 : f32
    %261 = vector.broadcast %cst_76 : f32 to vector<8x128xf32>
    %262 = arith.addf %261, %260 : vector<8x128xf32>
    %cst_77 = arith.constant 5.000000e-01 : f32
    %263 = vector.broadcast %cst_77 : f32 to vector<8x128xf32>
    %264 = arith.mulf %263, %262 : vector<8x128xf32>
    %265 = arith.mulf %252, %264 : vector<8x128xf32>
    %c512 = arith.constant 512 : index
    %c0_78 = arith.constant 0 : index
    %266 = vector.load %arg3[%c512, %c0_78] : memref<640x128xbf16, #tpu.memory_space<vmem>>, vector<128x32xbf16>
    %267 = arith.truncf %265 : vector<8x128xf32> to vector<8x128xbf16>
    %cst_79 = arith.constant dense<0.000000e+00> : vector<8x32xf32>
    %268 = tpu.matmul %267, %266, %cst_79 {dimension_numbers = #tpu.dot_dimension_numbers<[1], [0], [0], [1], [0, 0, 1, 1], [], []>} : vector<8x128xbf16>, vector<128x32xbf16>, vector<8x32xf32> -> vector<8x32xf32>
    %269 = arith.addf %222, %268 : vector<8x32xf32>
    %c128 = arith.constant 128 : index
    %c0_80 = arith.constant 0 : index
    %270 = vector.load %arg4[%c128, %c0_80] : memref<384x128xf32, #tpu.memory_space<vmem>>, vector<1x32xf32>
    %271 = vector.broadcast %270 : vector<1x32xf32> to vector<8x32xf32>
    %272 = arith.addf %269, %271 : vector<8x32xf32>
    %c136 = arith.constant 136 : index
    %c0_81 = arith.constant 0 : index
    %273 = vector.load %arg4[%c136, %c0_81] : memref<384x128xf32, #tpu.memory_space<vmem>>, vector<1x32xf32>
    %c144 = arith.constant 144 : index
    %c0_82 = arith.constant 0 : index
    %274 = vector.load %arg4[%c144, %c0_82] : memref<384x128xf32, #tpu.memory_space<vmem>>, vector<1x32xf32>
    %cst_83 = arith.constant dense<0.000000e+00> : vector<8xf32>
    %275 = vector.multi_reduction <add>, %272, %cst_83 [1] : vector<8x32xf32> to vector<8xf32>
    %276 = vector.shape_cast %275 : vector<8xf32> to vector<8x1xf32>
    %cst_84 = arith.constant 3.200000e+01 : f32
    %277 = vector.broadcast %cst_84 : f32 to vector<8x1xf32>
    %278 = arith.divf %276, %277 : vector<8x1xf32>
    %279 = vector.broadcast %278 : vector<8x1xf32> to vector<8x32xf32>
    %280 = arith.subf %272, %279 : vector<8x32xf32>
    %281 = arith.mulf %280, %280 : vector<8x32xf32>
    %cst_85 = arith.constant dense<0.000000e+00> : vector<8xf32>
    %282 = vector.multi_reduction <add>, %281, %cst_85 [1] : vector<8x32xf32> to vector<8xf32>
    %283 = vector.shape_cast %282 : vector<8xf32> to vector<8x1xf32>
    %cst_86 = arith.constant 3.200000e+01 : f32
    %284 = vector.broadcast %cst_86 : f32 to vector<8x1xf32>
    %285 = arith.divf %283, %284 : vector<8x1xf32>
    %286 = vector.broadcast %278 : vector<8x1xf32> to vector<8x32xf32>
    %287 = arith.subf %272, %286 : vector<8x32xf32>
    %cst_87 = arith.constant 9.99999996E-13 : f32
    %288 = vector.broadcast %cst_87 : f32 to vector<8x1xf32>
    %289 = arith.addf %285, %288 : vector<8x1xf32>
    %290 = math.rsqrt %289 : vector<8x1xf32>
    %291 = vector.broadcast %290 : vector<8x1xf32> to vector<8x32xf32>
    %292 = arith.mulf %287, %291 : vector<8x32xf32>
    %293 = vector.broadcast %273 : vector<1x32xf32> to vector<8x32xf32>
    %294 = arith.mulf %292, %293 : vector<8x32xf32>
    %295 = vector.broadcast %274 : vector<1x32xf32> to vector<8x32xf32>
    %296 = arith.addf %294, %295 : vector<8x32xf32>
    %297 = vector.broadcast %7 : vector<8x1xf32> to vector<8x32xf32>
    %298 = arith.mulf %296, %297 : vector<8x32xf32>
    %cst_88 = arith.constant dense<0.000000e+00> : vector<32xf32>
    %299 = vector.multi_reduction <add>, %298, %cst_88 [0] : vector<8x32xf32> to vector<32xf32>
    %300 = vector.shape_cast %299 : vector<32xf32> to vector<1x32xf32>
    %cst_89 = arith.constant 2.000000e-01 : f32
    %301 = vector.broadcast %cst_89 : f32 to vector<1x32xf32>
    %302 = arith.mulf %300, %301 : vector<1x32xf32>
    %c152 = arith.constant 152 : index
    %c0_90 = arith.constant 0 : index
    %303 = vector.load %arg4[%c152, %c0_90] : memref<384x128xf32, #tpu.memory_space<vmem>>, vector<32x16xf32>
    %cst_91 = arith.constant dense<0.000000e+00> : vector<1x16xf32>
    %304 = tpu.matmul %302, %303, %cst_91 {dimension_numbers = #tpu.dot_dimension_numbers<[1], [0], [0], [1], [0, 0, 1, 1], [], []>} : vector<1x32xf32>, vector<32x16xf32>, vector<1x16xf32> -> vector<1x16xf32>
    %c184 = arith.constant 184 : index
    %c0_92 = arith.constant 0 : index
    %305 = vector.load %arg4[%c184, %c0_92] : memref<384x128xf32, #tpu.memory_space<vmem>>, vector<1x16xf32>
    %306 = arith.addf %304, %305 : vector<1x16xf32>
    %c280 = arith.constant 280 : index
    %c0_93 = arith.constant 0 : index
    %307 = vector.load %arg4[%c280, %c0_93] : memref<384x128xf32, #tpu.memory_space<vmem>>, vector<32x16xf32>
    %cst_94 = arith.constant dense<0.000000e+00> : vector<8x16xf32>
    %308 = tpu.matmul %296, %307, %cst_94 {dimension_numbers = #tpu.dot_dimension_numbers<[1], [0], [0], [1], [0, 0, 1, 1], [], []>} : vector<8x32xf32>, vector<32x16xf32>, vector<8x16xf32> -> vector<8x16xf32>
    %c264 = arith.constant 264 : index
    %c0_95 = arith.constant 0 : index
    %309 = vector.load %arg4[%c264, %c0_95] : memref<384x128xf32, #tpu.memory_space<vmem>>, vector<16x16xf32>
    %c312 = arith.constant 312 : index
    %c0_96 = arith.constant 0 : index
    %310 = vector.load %arg4[%c312, %c0_96] : memref<384x128xf32, #tpu.memory_space<vmem>>, vector<1x16xf32>
    %c320 = arith.constant 320 : index
    %c0_97 = arith.constant 0 : index
    %311 = vector.load %arg4[%c320, %c0_97] : memref<384x128xf32, #tpu.memory_space<vmem>>, vector<1x16xf32>
    %c192_98 = arith.constant 192 : index
    %c0_99 = arith.constant 0 : index
    %312 = vector.load %arg4[%c192_98, %c0_99] : memref<384x128xf32, #tpu.memory_space<vmem>>, vector<18x64xf32>
    %c216 = arith.constant 216 : index
    %c0_100 = arith.constant 0 : index
    %313 = vector.load %arg4[%c216, %c0_100] : memref<384x128xf32, #tpu.memory_space<vmem>>, vector<1x64xf32>
    %c224_101 = arith.constant 224 : index
    %c0_102 = arith.constant 0 : index
    %314 = vector.load %arg4[%c224_101, %c0_102] : memref<384x128xf32, #tpu.memory_space<vmem>>, vector<32x64xf32>
    %c256_103 = arith.constant 256 : index
    %c0_104 = arith.constant 0 : index
    %315 = vector.load %arg4[%c256_103, %c0_104] : memref<384x128xf32, #tpu.memory_space<vmem>>, vector<1x64xf32>
    %c328 = arith.constant 328 : index
    %c0_105 = arith.constant 0 : index
    %316 = vector.load %arg4[%c328, %c0_105] : memref<384x128xf32, #tpu.memory_space<vmem>>, vector<48x2xf32>
    %c376 = arith.constant 376 : index
    %c0_106 = arith.constant 0 : index
    %317 = vector.load %arg4[%c376, %c0_106] : memref<384x128xf32, #tpu.memory_space<vmem>>, vector<1x2xf32>
    %cst_107 = arith.constant 0.000000e+00 : f32
    %318 = vector.broadcast %cst_107 : f32 to vector<1x16xf32>
    %cst_108 = arith.constant 0.000000e+00 : f32
    %319 = vector.broadcast %cst_108 : f32 to vector<1x16xf32>
    %c0_109 = arith.constant 0 : index
    %c0_110 = arith.constant 0 : index
    %c0_111 = arith.constant 0 : index
    %320 = vector.load %arg2[%c0_109, %c0_110, %c0_111] : memref<1x1x2xf32, #tpu.memory_space<vmem>>, vector<1x1x2xf32>
    %321 = vector.shape_cast %320 : vector<1x1x2xf32> to vector<1x2xf32>
    %322 = tpu.concatenate %321, %306 in 1 : vector<1x2xf32>, vector<1x16xf32> -> vector<1x18xf32>
    %cst_112 = arith.constant dense<0.000000e+00> : vector<1x64xf32>
    %323 = tpu.matmul %322, %312, %cst_112 {dimension_numbers = #tpu.dot_dimension_numbers<[1], [0], [0], [1], [0, 0, 1, 1], [], []>} : vector<1x18xf32>, vector<18x64xf32>, vector<1x64xf32> -> vector<1x64xf32>
    %324 = arith.addf %323, %313 : vector<1x64xf32>
    %325 = vector.extract_strided_slice %324 {offsets = [0, 0], sizes = [1, 48], strides = [1, 1]} : vector<1x64xf32> to vector<1x48xf32>
    %326 = arith.negf %325 : vector<1x48xf32>
    %327 = math.exp %326 : vector<1x48xf32>
    %cst_113 = arith.constant 1.000000e+00 : f32
    %328 = vector.broadcast %cst_113 : f32 to vector<1x48xf32>
    %329 = arith.addf %328, %327 : vector<1x48xf32>
    %330 = arith.divf %328, %329 : vector<1x48xf32>
    %331 = vector.extract_strided_slice %330 {offsets = [0, 0], sizes = [1, 16], strides = [1, 1]} : vector<1x48xf32> to vector<1x16xf32>
    %332 = vector.extract_strided_slice %330 {offsets = [0, 16], sizes = [1, 16], strides = [1, 1]} : vector<1x48xf32> to vector<1x16xf32>
    %333 = vector.extract_strided_slice %330 {offsets = [0, 32], sizes = [1, 16], strides = [1, 1]} : vector<1x48xf32> to vector<1x16xf32>
    %334 = vector.extract_strided_slice %324 {offsets = [0, 48], sizes = [1, 16], strides = [1, 1]} : vector<1x64xf32> to vector<1x16xf32>
    %335 = math.tanh %334 : vector<1x16xf32>
    %336 = arith.mulf %332, %318 : vector<1x16xf32>
    %337 = arith.mulf %331, %335 : vector<1x16xf32>
    %338 = arith.addf %336, %337 : vector<1x16xf32>
    %339 = math.tanh %338 : vector<1x16xf32>
    %340 = arith.mulf %333, %339 : vector<1x16xf32>
    %341 = tpu.concatenate %340, %306 in 1 : vector<1x16xf32>, vector<1x16xf32> -> vector<1x32xf32>
    %cst_114 = arith.constant dense<0.000000e+00> : vector<1x64xf32>
    %342 = tpu.matmul %341, %314, %cst_114 {dimension_numbers = #tpu.dot_dimension_numbers<[1], [0], [0], [1], [0, 0, 1, 1], [], []>} : vector<1x32xf32>, vector<32x64xf32>, vector<1x64xf32> -> vector<1x64xf32>
    %343 = arith.addf %342, %315 : vector<1x64xf32>
    %344 = vector.extract_strided_slice %343 {offsets = [0, 0], sizes = [1, 48], strides = [1, 1]} : vector<1x64xf32> to vector<1x48xf32>
    %345 = arith.negf %344 : vector<1x48xf32>
    %346 = math.exp %345 : vector<1x48xf32>
    %cst_115 = arith.constant 1.000000e+00 : f32
    %347 = vector.broadcast %cst_115 : f32 to vector<1x48xf32>
    %348 = arith.addf %347, %346 : vector<1x48xf32>
    %349 = arith.divf %347, %348 : vector<1x48xf32>
    %350 = vector.extract_strided_slice %349 {offsets = [0, 0], sizes = [1, 16], strides = [1, 1]} : vector<1x48xf32> to vector<1x16xf32>
    %351 = vector.extract_strided_slice %349 {offsets = [0, 16], sizes = [1, 16], strides = [1, 1]} : vector<1x48xf32> to vector<1x16xf32>
    %352 = vector.extract_strided_slice %349 {offsets = [0, 32], sizes = [1, 16], strides = [1, 1]} : vector<1x48xf32> to vector<1x16xf32>
    %353 = vector.extract_strided_slice %343 {offsets = [0, 48], sizes = [1, 16], strides = [1, 1]} : vector<1x64xf32> to vector<1x16xf32>
    %354 = math.tanh %353 : vector<1x16xf32>
    %355 = arith.mulf %351, %319 : vector<1x16xf32>
    %356 = arith.mulf %350, %354 : vector<1x16xf32>
    %357 = arith.addf %355, %356 : vector<1x16xf32>
    %358 = math.tanh %357 : vector<1x16xf32>
    %359 = arith.mulf %352, %358 : vector<1x16xf32>
    %cst_116 = arith.constant dense<0.000000e+00> : vector<1x16xf32>
    %360 = tpu.matmul %359, %309, %cst_116 {dimension_numbers = #tpu.dot_dimension_numbers<[1], [0], [0], [1], [0, 0, 1, 1], [], []>} : vector<1x16xf32>, vector<16x16xf32>, vector<1x16xf32> -> vector<1x16xf32>
    %361 = vector.broadcast %360 : vector<1x16xf32> to vector<8x16xf32>
    %362 = arith.addf %308, %361 : vector<8x16xf32>
    %363 = vector.broadcast %310 : vector<1x16xf32> to vector<8x16xf32>
    %364 = arith.addf %362, %363 : vector<8x16xf32>
    %365 = math.tanh %364 : vector<8x16xf32>
    %366 = vector.broadcast %311 : vector<1x16xf32> to vector<8x16xf32>
    %367 = arith.mulf %365, %366 : vector<8x16xf32>
    %cst_117 = arith.constant dense<0.000000e+00> : vector<8xf32>
    %368 = vector.multi_reduction <add>, %367, %cst_117 [1] : vector<8x16xf32> to vector<8xf32>
    %369 = vector.shape_cast %368 : vector<8xf32> to vector<8x1xf32>
    %cst_118 = arith.constant -1.000000e+30 : f32
    %370 = vector.broadcast %cst_118 : f32 to vector<8x1xf32>
    %371 = arith.select %5, %369, %370 : vector<8x1xi1>, vector<8x1xf32>
    %cst_119 = arith.constant dense<0xFF800000> : vector<1xf32>
    %372 = vector.multi_reduction <maximumf>, %371, %cst_119 [0] : vector<8x1xf32> to vector<1xf32>
    %373 = vector.shape_cast %372 : vector<1xf32> to vector<1x1xf32>
    %374 = vector.broadcast %373 : vector<1x1xf32> to vector<8x1xf32>
    %375 = arith.subf %371, %374 : vector<8x1xf32>
    %376 = math.exp %375 : vector<8x1xf32>
    %cst_120 = arith.constant dense<0.000000e+00> : vector<1xf32>
    %377 = vector.multi_reduction <add>, %376, %cst_120 [0] : vector<8x1xf32> to vector<1xf32>
    %378 = vector.shape_cast %377 : vector<1xf32> to vector<1x1xf32>
    %379 = vector.broadcast %378 : vector<1x1xf32> to vector<8x1xf32>
    %380 = arith.divf %376, %379 : vector<8x1xf32>
    %381 = vector.broadcast %380 : vector<8x1xf32> to vector<8x32xf32>
    %382 = arith.mulf %381, %296 : vector<8x32xf32>
    %cst_121 = arith.constant dense<0.000000e+00> : vector<32xf32>
    %383 = vector.multi_reduction <add>, %382, %cst_121 [0] : vector<8x32xf32> to vector<32xf32>
    %384 = vector.shape_cast %383 : vector<32xf32> to vector<1x32xf32>
    %385 = tpu.concatenate %359, %384 in 1 : vector<1x16xf32>, vector<1x32xf32> -> vector<1x48xf32>
    %cst_122 = arith.constant dense<0.000000e+00> : vector<1x2xf32>
    %386 = tpu.matmul %385, %316, %cst_122 {dimension_numbers = #tpu.dot_dimension_numbers<[1], [0], [0], [1], [0, 0, 1, 1], [], []>} : vector<1x48xf32>, vector<48x2xf32>, vector<1x2xf32> -> vector<1x2xf32>
    %387 = arith.addf %386, %317 : vector<1x2xf32>
    %388 = tpu.concatenate %387, %340 in 1 : vector<1x2xf32>, vector<1x16xf32> -> vector<1x18xf32>
    %cst_123 = arith.constant dense<0.000000e+00> : vector<1x64xf32>
    %389 = tpu.matmul %388, %312, %cst_123 {dimension_numbers = #tpu.dot_dimension_numbers<[1], [0], [0], [1], [0, 0, 1, 1], [], []>} : vector<1x18xf32>, vector<18x64xf32>, vector<1x64xf32> -> vector<1x64xf32>
    %390 = arith.addf %389, %313 : vector<1x64xf32>
    %391 = vector.extract_strided_slice %390 {offsets = [0, 0], sizes = [1, 48], strides = [1, 1]} : vector<1x64xf32> to vector<1x48xf32>
    %392 = arith.negf %391 : vector<1x48xf32>
    %393 = math.exp %392 : vector<1x48xf32>
    %cst_124 = arith.constant 1.000000e+00 : f32
    %394 = vector.broadcast %cst_124 : f32 to vector<1x48xf32>
    %395 = arith.addf %394, %393 : vector<1x48xf32>
    %396 = arith.divf %394, %395 : vector<1x48xf32>
    %397 = vector.extract_strided_slice %396 {offsets = [0, 0], sizes = [1, 16], strides = [1, 1]} : vector<1x48xf32> to vector<1x16xf32>
    %398 = vector.extract_strided_slice %396 {offsets = [0, 16], sizes = [1, 16], strides = [1, 1]} : vector<1x48xf32> to vector<1x16xf32>
    %399 = vector.extract_strided_slice %396 {offsets = [0, 32], sizes = [1, 16], strides = [1, 1]} : vector<1x48xf32> to vector<1x16xf32>
    %400 = vector.extract_strided_slice %390 {offsets = [0, 48], sizes = [1, 16], strides = [1, 1]} : vector<1x64xf32> to vector<1x16xf32>
    %401 = math.tanh %400 : vector<1x16xf32>
    %402 = arith.mulf %398, %338 : vector<1x16xf32>
    %403 = arith.mulf %397, %401 : vector<1x16xf32>
    %404 = arith.addf %402, %403 : vector<1x16xf32>
    %405 = math.tanh %404 : vector<1x16xf32>
    %406 = arith.mulf %399, %405 : vector<1x16xf32>
    %407 = tpu.concatenate %406, %359 in 1 : vector<1x16xf32>, vector<1x16xf32> -> vector<1x32xf32>
    %cst_125 = arith.constant dense<0.000000e+00> : vector<1x64xf32>
    %408 = tpu.matmul %407, %314, %cst_125 {dimension_numbers = #tpu.dot_dimension_numbers<[1], [0], [0], [1], [0, 0, 1, 1], [], []>} : vector<1x32xf32>, vector<32x64xf32>, vector<1x64xf32> -> vector<1x64xf32>
    %409 = arith.addf %408, %315 : vector<1x64xf32>
    %410 = vector.extract_strided_slice %409 {offsets = [0, 0], sizes = [1, 48], strides = [1, 1]} : vector<1x64xf32> to vector<1x48xf32>
    %411 = arith.negf %410 : vector<1x48xf32>
    %412 = math.exp %411 : vector<1x48xf32>
    %cst_126 = arith.constant 1.000000e+00 : f32
    %413 = vector.broadcast %cst_126 : f32 to vector<1x48xf32>
    %414 = arith.addf %413, %412 : vector<1x48xf32>
    %415 = arith.divf %413, %414 : vector<1x48xf32>
    %416 = vector.extract_strided_slice %415 {offsets = [0, 0], sizes = [1, 16], strides = [1, 1]} : vector<1x48xf32> to vector<1x16xf32>
    %417 = vector.extract_strided_slice %415 {offsets = [0, 16], sizes = [1, 16], strides = [1, 1]} : vector<1x48xf32> to vector<1x16xf32>
    %418 = vector.extract_strided_slice %415 {offsets = [0, 32], sizes = [1, 16], strides = [1, 1]} : vector<1x48xf32> to vector<1x16xf32>
    %419 = vector.extract_strided_slice %409 {offsets = [0, 48], sizes = [1, 16], strides = [1, 1]} : vector<1x64xf32> to vector<1x16xf32>
    %420 = math.tanh %419 : vector<1x16xf32>
    %421 = arith.mulf %417, %357 : vector<1x16xf32>
    %422 = arith.mulf %416, %420 : vector<1x16xf32>
    %423 = arith.addf %421, %422 : vector<1x16xf32>
    %424 = math.tanh %423 : vector<1x16xf32>
    %425 = arith.mulf %418, %424 : vector<1x16xf32>
    %cst_127 = arith.constant dense<0.000000e+00> : vector<1x16xf32>
    %426 = tpu.matmul %425, %309, %cst_127 {dimension_numbers = #tpu.dot_dimension_numbers<[1], [0], [0], [1], [0, 0, 1, 1], [], []>} : vector<1x16xf32>, vector<16x16xf32>, vector<1x16xf32> -> vector<1x16xf32>
    %427 = vector.broadcast %426 : vector<1x16xf32> to vector<8x16xf32>
    %428 = arith.addf %308, %427 : vector<8x16xf32>
    %429 = vector.broadcast %310 : vector<1x16xf32> to vector<8x16xf32>
    %430 = arith.addf %428, %429 : vector<8x16xf32>
    %431 = math.tanh %430 : vector<8x16xf32>
    %432 = vector.broadcast %311 : vector<1x16xf32> to vector<8x16xf32>
    %433 = arith.mulf %431, %432 : vector<8x16xf32>
    %cst_128 = arith.constant dense<0.000000e+00> : vector<8xf32>
    %434 = vector.multi_reduction <add>, %433, %cst_128 [1] : vector<8x16xf32> to vector<8xf32>
    %435 = vector.shape_cast %434 : vector<8xf32> to vector<8x1xf32>
    %cst_129 = arith.constant -1.000000e+30 : f32
    %436 = vector.broadcast %cst_129 : f32 to vector<8x1xf32>
    %437 = arith.select %5, %435, %436 : vector<8x1xi1>, vector<8x1xf32>
    %cst_130 = arith.constant dense<0xFF800000> : vector<1xf32>
    %438 = vector.multi_reduction <maximumf>, %437, %cst_130 [0] : vector<8x1xf32> to vector<1xf32>
    %439 = vector.shape_cast %438 : vector<1xf32> to vector<1x1xf32>
    %440 = vector.broadcast %439 : vector<1x1xf32> to vector<8x1xf32>
    %441 = arith.subf %437, %440 : vector<8x1xf32>
    %442 = math.exp %441 : vector<8x1xf32>
    %cst_131 = arith.constant dense<0.000000e+00> : vector<1xf32>
    %443 = vector.multi_reduction <add>, %442, %cst_131 [0] : vector<8x1xf32> to vector<1xf32>
    %444 = vector.shape_cast %443 : vector<1xf32> to vector<1x1xf32>
    %445 = vector.broadcast %444 : vector<1x1xf32> to vector<8x1xf32>
    %446 = arith.divf %442, %445 : vector<8x1xf32>
    %447 = vector.broadcast %446 : vector<8x1xf32> to vector<8x32xf32>
    %448 = arith.mulf %447, %296 : vector<8x32xf32>
    %cst_132 = arith.constant dense<0.000000e+00> : vector<32xf32>
    %449 = vector.multi_reduction <add>, %448, %cst_132 [0] : vector<8x32xf32> to vector<32xf32>
    %450 = vector.shape_cast %449 : vector<32xf32> to vector<1x32xf32>
    %451 = tpu.concatenate %425, %450 in 1 : vector<1x16xf32>, vector<1x32xf32> -> vector<1x48xf32>
    %cst_133 = arith.constant dense<0.000000e+00> : vector<1x2xf32>
    %452 = tpu.matmul %451, %316, %cst_133 {dimension_numbers = #tpu.dot_dimension_numbers<[1], [0], [0], [1], [0, 0, 1, 1], [], []>} : vector<1x48xf32>, vector<48x2xf32>, vector<1x2xf32> -> vector<1x2xf32>
    %453 = arith.addf %452, %317 : vector<1x2xf32>
    %454 = tpu.concatenate %453, %406 in 1 : vector<1x2xf32>, vector<1x16xf32> -> vector<1x18xf32>
    %cst_134 = arith.constant dense<0.000000e+00> : vector<1x64xf32>
    %455 = tpu.matmul %454, %312, %cst_134 {dimension_numbers = #tpu.dot_dimension_numbers<[1], [0], [0], [1], [0, 0, 1, 1], [], []>} : vector<1x18xf32>, vector<18x64xf32>, vector<1x64xf32> -> vector<1x64xf32>
    %456 = arith.addf %455, %313 : vector<1x64xf32>
    %457 = vector.extract_strided_slice %456 {offsets = [0, 0], sizes = [1, 48], strides = [1, 1]} : vector<1x64xf32> to vector<1x48xf32>
    %458 = arith.negf %457 : vector<1x48xf32>
    %459 = math.exp %458 : vector<1x48xf32>
    %cst_135 = arith.constant 1.000000e+00 : f32
    %460 = vector.broadcast %cst_135 : f32 to vector<1x48xf32>
    %461 = arith.addf %460, %459 : vector<1x48xf32>
    %462 = arith.divf %460, %461 : vector<1x48xf32>
    %463 = vector.extract_strided_slice %462 {offsets = [0, 0], sizes = [1, 16], strides = [1, 1]} : vector<1x48xf32> to vector<1x16xf32>
    %464 = vector.extract_strided_slice %462 {offsets = [0, 16], sizes = [1, 16], strides = [1, 1]} : vector<1x48xf32> to vector<1x16xf32>
    %465 = vector.extract_strided_slice %462 {offsets = [0, 32], sizes = [1, 16], strides = [1, 1]} : vector<1x48xf32> to vector<1x16xf32>
    %466 = vector.extract_strided_slice %456 {offsets = [0, 48], sizes = [1, 16], strides = [1, 1]} : vector<1x64xf32> to vector<1x16xf32>
    %467 = math.tanh %466 : vector<1x16xf32>
    %468 = arith.mulf %464, %404 : vector<1x16xf32>
    %469 = arith.mulf %463, %467 : vector<1x16xf32>
    %470 = arith.addf %468, %469 : vector<1x16xf32>
    %471 = math.tanh %470 : vector<1x16xf32>
    %472 = arith.mulf %465, %471 : vector<1x16xf32>
    %473 = tpu.concatenate %472, %425 in 1 : vector<1x16xf32>, vector<1x16xf32> -> vector<1x32xf32>
    %cst_136 = arith.constant dense<0.000000e+00> : vector<1x64xf32>
    %474 = tpu.matmul %473, %314, %cst_136 {dimension_numbers = #tpu.dot_dimension_numbers<[1], [0], [0], [1], [0, 0, 1, 1], [], []>} : vector<1x32xf32>, vector<32x64xf32>, vector<1x64xf32> -> vector<1x64xf32>
    %475 = arith.addf %474, %315 : vector<1x64xf32>
    %476 = vector.extract_strided_slice %475 {offsets = [0, 0], sizes = [1, 48], strides = [1, 1]} : vector<1x64xf32> to vector<1x48xf32>
    %477 = arith.negf %476 : vector<1x48xf32>
    %478 = math.exp %477 : vector<1x48xf32>
    %cst_137 = arith.constant 1.000000e+00 : f32
    %479 = vector.broadcast %cst_137 : f32 to vector<1x48xf32>
    %480 = arith.addf %479, %478 : vector<1x48xf32>
    %481 = arith.divf %479, %480 : vector<1x48xf32>
    %482 = vector.extract_strided_slice %481 {offsets = [0, 0], sizes = [1, 16], strides = [1, 1]} : vector<1x48xf32> to vector<1x16xf32>
    %483 = vector.extract_strided_slice %481 {offsets = [0, 16], sizes = [1, 16], strides = [1, 1]} : vector<1x48xf32> to vector<1x16xf32>
    %484 = vector.extract_strided_slice %481 {offsets = [0, 32], sizes = [1, 16], strides = [1, 1]} : vector<1x48xf32> to vector<1x16xf32>
    %485 = vector.extract_strided_slice %475 {offsets = [0, 48], sizes = [1, 16], strides = [1, 1]} : vector<1x64xf32> to vector<1x16xf32>
    %486 = math.tanh %485 : vector<1x16xf32>
    %487 = arith.mulf %483, %423 : vector<1x16xf32>
    %488 = arith.mulf %482, %486 : vector<1x16xf32>
    %489 = arith.addf %487, %488 : vector<1x16xf32>
    %490 = math.tanh %489 : vector<1x16xf32>
    %491 = arith.mulf %484, %490 : vector<1x16xf32>
    %cst_138 = arith.constant dense<0.000000e+00> : vector<1x16xf32>
    %492 = tpu.matmul %491, %309, %cst_138 {dimension_numbers = #tpu.dot_dimension_numbers<[1], [0], [0], [1], [0, 0, 1, 1], [], []>} : vector<1x16xf32>, vector<16x16xf32>, vector<1x16xf32> -> vector<1x16xf32>
    %493 = vector.broadcast %492 : vector<1x16xf32> to vector<8x16xf32>
    %494 = arith.addf %308, %493 : vector<8x16xf32>
    %495 = vector.broadcast %310 : vector<1x16xf32> to vector<8x16xf32>
    %496 = arith.addf %494, %495 : vector<8x16xf32>
    %497 = math.tanh %496 : vector<8x16xf32>
    %498 = vector.broadcast %311 : vector<1x16xf32> to vector<8x16xf32>
    %499 = arith.mulf %497, %498 : vector<8x16xf32>
    %cst_139 = arith.constant dense<0.000000e+00> : vector<8xf32>
    %500 = vector.multi_reduction <add>, %499, %cst_139 [1] : vector<8x16xf32> to vector<8xf32>
    %501 = vector.shape_cast %500 : vector<8xf32> to vector<8x1xf32>
    %cst_140 = arith.constant -1.000000e+30 : f32
    %502 = vector.broadcast %cst_140 : f32 to vector<8x1xf32>
    %503 = arith.select %5, %501, %502 : vector<8x1xi1>, vector<8x1xf32>
    %cst_141 = arith.constant dense<0xFF800000> : vector<1xf32>
    %504 = vector.multi_reduction <maximumf>, %503, %cst_141 [0] : vector<8x1xf32> to vector<1xf32>
    %505 = vector.shape_cast %504 : vector<1xf32> to vector<1x1xf32>
    %506 = vector.broadcast %505 : vector<1x1xf32> to vector<8x1xf32>
    %507 = arith.subf %503, %506 : vector<8x1xf32>
    %508 = math.exp %507 : vector<8x1xf32>
    %cst_142 = arith.constant dense<0.000000e+00> : vector<1xf32>
    %509 = vector.multi_reduction <add>, %508, %cst_142 [0] : vector<8x1xf32> to vector<1xf32>
    %510 = vector.shape_cast %509 : vector<1xf32> to vector<1x1xf32>
    %511 = vector.broadcast %510 : vector<1x1xf32> to vector<8x1xf32>
    %512 = arith.divf %508, %511 : vector<8x1xf32>
    %513 = vector.broadcast %512 : vector<8x1xf32> to vector<8x32xf32>
    %514 = arith.mulf %513, %296 : vector<8x32xf32>
    %cst_143 = arith.constant dense<0.000000e+00> : vector<32xf32>
    %515 = vector.multi_reduction <add>, %514, %cst_143 [0] : vector<8x32xf32> to vector<32xf32>
    %516 = vector.shape_cast %515 : vector<32xf32> to vector<1x32xf32>
    %517 = tpu.concatenate %491, %516 in 1 : vector<1x16xf32>, vector<1x32xf32> -> vector<1x48xf32>
    %cst_144 = arith.constant dense<0.000000e+00> : vector<1x2xf32>
    %518 = tpu.matmul %517, %316, %cst_144 {dimension_numbers = #tpu.dot_dimension_numbers<[1], [0], [0], [1], [0, 0, 1, 1], [], []>} : vector<1x48xf32>, vector<48x2xf32>, vector<1x2xf32> -> vector<1x2xf32>
    %519 = arith.addf %518, %317 : vector<1x2xf32>
    %520 = tpu.concatenate %387, %453, %519 in 0 : vector<1x2xf32>, vector<1x2xf32>, vector<1x2xf32> -> vector<3x2xf32>
    %c0_145 = arith.constant 0 : index
    %c0_146 = arith.constant 0 : index
    %c0_147 = arith.constant 0 : index
    %521 = vector.load %arg5[%c0_145, %c0_146, %c0_147] : memref<1x3x2xf32, #tpu.memory_space<vmem>>, vector<1x3x2xf32>
    %522 = vector.shape_cast %521 : vector<1x3x2xf32> to vector<3x2xf32>
    %523 = vector.shape_cast %520 : vector<3x2xf32> to vector<1x3x2xf32>
    tpu.vector_store %arg5[%c0_145, %c0_146, %c0_147], %523 {strides = array<i32>} : memref<1x3x2xf32, #tpu.memory_space<vmem>>, vector<1x3x2xf32>,
    return
  }
  func.func @transform_0(%arg0: i32) -> (i32, i32, i32) {
    %c0_i32 = arith.constant 0 : i32
    %c0_i32_0 = arith.constant 0 : i32
    %c0_i32_1 = arith.constant 0 : i32
    return %arg0, %c0_i32, %c0_i32_0 : i32, i32, i32
  }
  func.func @transform_1(%arg0: i32) -> (i32, i32, i32) {
    %c0_i32 = arith.constant 0 : i32
    %c0_i32_0 = arith.constant 0 : i32
    %c0_i32_1 = arith.constant 0 : i32
    return %arg0, %c0_i32, %c0_i32_0 : i32, i32, i32
  }
  func.func @transform_2(%arg0: i32) -> (i32, i32) {
    %c0_i32 = arith.constant 0 : i32
    %c0_i32_0 = arith.constant 0 : i32
    %c0_i32_1 = arith.constant 0 : i32
    return %c0_i32, %c0_i32_0 : i32, i32
  }
  func.func @transform_3(%arg0: i32) -> (i32, i32) {
    %c0_i32 = arith.constant 0 : i32
    %c0_i32_0 = arith.constant 0 : i32
    %c0_i32_1 = arith.constant 0 : i32
    return %c0_i32, %c0_i32_0 : i32, i32
  }
  func.func @transform_4(%arg0: i32) -> (i32, i32, i32) {
    %c0_i32 = arith.constant 0 : i32
    %c0_i32_0 = arith.constant 0 : i32
    %c0_i32_1 = arith.constant 0 : i32
    return %arg0, %c0_i32, %c0_i32_0 : i32, i32, i32
  }
}

</mosaic_0001>

<bundles_post_ra>
// kernel: forward.1
= control target key start
LH: loop header
LB: loop body
LE: loop exit
PB: predicated region body
PF: predicated region fallthrough
CT: control target
= control target key end

     0   :  { %s3978_s15 = smov 0   ;;  %s4743_s0 = inlined_call_operand.vmem [shape: f32[2,8,192], index: 0, kind: input, shape index: {}]   ;;  %s4744_s1 = inlined_call_operand.vmem [shape: f32[2,1,2], index: 1, kind: input, shape index: {}]   ;;  %s4745_s2 = inlined_call_operand.vmem [shape: bf16[640,128], index: 2, kind: input, shape index: {}]   ;;  %s4746_s3 = inlined_call_operand.vmem [shape: f32[384,128], index: 3, kind: input, shape index: {}]   ;;  %s4747_s4 = inlined_call_operand.vmem [shape: f32[2,3,2], index: 4, kind: output, shape index: {}]  }
   0x1 LB: > { %s3272_s16 = sadd.s32 4294967295, %s3941_s15   ;;  %p3276_p0 = scmp.ge.s32.totalorder %s3941_s15, 1  ;;  %s3941_s15 = sphi %s3978_s15, %s14_s15  }
   0x2   : > { %p170_p1 = scmp.lt.s32.totalorder %s3941_s15, 3 }
   0x4   : > { %p171_p2 = pnand %p3276_p0, %p170_p1 }
   0x5   : > { %p198_p3 = scmp.lt.s32.totalorder (!%p171_p2), %s3272_s16, 1  ;;  %s3946_s7 = smov (!%p171_p2), 112  }
   0x6   : > { %174 = sbr.rel (%p171_p2) target bundleno = 12231 (0x2fc7), region = 36  ;;  %s3947_s8 = smov (!%p171_p2), 96  }
   0x7   : > { %s3948_s9 = smov (!%p171_p2), 64   ;;  %s3949_s14 = smov (!%p171_p2), 16  }
   0x8   : > { %s3950_s13 = smov (!%p171_p2), 2   ;;  %s3951_s21 = smov (!%p171_p2), 80  }
   0x9   : > { %s3952_s6 = smov (!%p171_p2), 98  }
   0xb   : > { %v3799_v0 = vld [vmem:[%s4745_s2 + $0x38] sm:$0xff]   ;;  %v3943_v1 = vmov 0   ;;  %v3800_v2 = vld [vmem:[%s4745_s2 + $0x30] sm:$0xff]   ;;  %s4749_s16 = smov (!%p198_p3, %s3272_s16), 1  ;;  %v3801_v3 = vld [vmem:[%s4745_s2 + $0x28] sm:$0xff]   ;;  %vm320_vm0 = vcmask 523264   ;;  %v211_v51 = vlaneseq }
   0xc   : > { %324 = vmatprep.subr.bf16.mxu0 %v3943_v1  ;;  %s3385_s23 = sshll.u32 %s4749_s16, 4  ;;  %v3802_v4 = vld [vmem:[%s4745_s2 + $0x20] sm:$0xff]   ;;  %v3803_v5 = vld [vmem:[%s4745_s2 + $0x18] sm:$0xff]   ;;  %v3804_v8 = vld [vmem:[%s4745_s2 + $0x10] sm:$0xff]   ;;  %vm366_vm1 = vcmask 261120   ;;  %v3944_v30 = vmov 0.0   ;;  %s205_s18 = scalar_lea.vmem %s4744_s1, %s4749_s16 }
   0xd   : > { %325 = vmatpush1.bf16.msra.mxu0 %v3799_v0  ;;  %s4001_s26 = scalar_lea.vmem %s4743_s0, %s3385_s23  ;;  %v3805_v9 = vld [vmem:[%s4745_s2 + $0x8] sm:$0xff]   ;;  %v3806_v10 = vld [vmem:[%s4745_s2] sm:$0xff]   ;;  %v3807_v11 = vld [vmem:[%s4745_s2 + $0x58] sm:$0xff]   ;;  %3505 = vmatprep.subr.bf16.mxu1 %v3944_v30  ;;  %vm3945_vm2 = vmmov 0   ;;  %vm461_vm3 = vcmask 130048   ;;  %v4081_v52 = vand.u32 127, %v211_v51 }
   0xe   : > { %326 = vmatprep.subr.bf16.mxu0 %v3943_v1  ;;  %v220_v6 = vld [vmem:[%s4001_s26 + $0x8] sm:$0xff]  ;;  %v3808_v12 = vld [vmem:[%s4745_s2 + $0x50] sm:$0xff]   ;;  %v3810_v14 = vld [vmem:[%s4745_s2 + $0x40] sm:$0xff]   ;;  %3509 = vmatprep.mubr.msk.bf16.mxu1 %vm3945_vm2, %v3944_v30  ;;  %vm618_vm5 = vcmask 64512   ;;  %vm2002_vm7 = vcmask 1041408   ;;  %vm1996_vm8 = vcmask 15360  }
   0xf   : > { %v246_v7 = vpack.c.bf16 %v220_v6, %v220_v6  ;;  %v3809_v13 = vld [vmem:[%s4745_s2 + $0x48] sm:$0xff]   ;;  %v219_v15 = vld [vmem:[%s4001_s26] sm:$0xff]  ;;  %v3295_v38 = vld [vmem:[%s4746_s3 + $0x10] ss:$0 sm:$0xff]  ;;  %vm213_vm4 = vcmp.lt.s32.totalorder %v4081_v52, 5  ;;  %vm1998_vm9 = vcmask 146432  }
  0x10   : > { %v245_v16 = vpack.c.bf16 %v219_v15, %v219_v15  ;;  %v247_v17 = vld [vmem:[%s4746_s3] sm:$0xff]  ;;  %v3811_v29 = vld [vmem:[%s4745_s2 + $0x68] sm:$0xff]   ;;  %v3296_v42 = vld [vmem:[%s4746_s3 + $0x18] ss:$0 sm:$0xff]  ;;  %vm2331_vm10 = vcmask 392192   ;;  %vm3205_vm11 = vcmask 1040384  }
  0x11   : > { %327 = vmatpush1.bf16.msra.mxu0 %v3800_v2  ;;  %3293 = vmatprep.mubr.msk.bf16.mxu0 %vm320_vm0, %v246_v7  ;;  %v3812_v31 = vld [vmem:[%s4745_s2 + $0x60] sm:$0xff]   ;;  %v3294_v36 = vld [vmem:[%s4746_s3 + $0x8] ss:$0 sm:$0xff]  ;;  %vm3208_vm12 = vcmask 10240  }
  0x12   : > { %328 = vmatprep.subr.bf16.mxu0 %v3943_v1  ;;  %3506 = vmatpush3.bf16.msra.mxu1 %v3811_v29 }
  0x13   : > { %3507 = vmatprep.subr.bf16.mxu1 %v3944_v30 }
  0x15   : > { %329 = vmatpush1.bf16.msra.mxu0 %v3801_v3 }
  0x16   : > { %330 = vmatprep.subr.bf16.mxu0 %v3943_v1  ;;  %3508 = vmatpush3.bf16.msra.mxu1 %v3812_v31 }
  0x17   : > { %3513 = vmatprep.subr.mxu1 %v3944_v30 }
  0x19   : > { %331 = vmatpush1.bf16.msra.mxu0 %v3802_v4 }
  0x1a   : > { %332 = vmatprep.subr.bf16.mxu0 %v3943_v1 }
  0x1d   : > { %333 = vmatpush1.bf16.msra.mxu0 %v3803_v5 }
  0x1e   : > { %334 = vmatprep.subr.bf16.mxu0 %v3943_v1 }
  0x21   : > { %335 = vmatpush1.bf16.msra.mxu0 %v3804_v8 }
  0x22   : > { %336 = vmatprep.subr.bf16.mxu0 %v3943_v1 }
  0x25   : > { %337 = vmatpush1.bf16.msra.mxu0 %v3805_v9 }
  0x26   : > { %338 = vmatprep.subr.bf16.mxu0 %v3943_v1 }
  0x29   : > { %339 = vmatpush1.bf16.msra.mxu0 %v3806_v10 }
  0x2a   : > { %348 = vmatprep.subr.bf16.mxu0 %v3943_v1 }
  0x2d   : > { %349 = vmatpush2.bf16.msra.mxu0 %v3807_v11 }
  0x2e   : > { %350 = vmatprep.subr.bf16.mxu0 %v3943_v1 }
  0x31   : > { %351 = vmatpush2.bf16.msra.mxu0 %v3808_v12 }
  0x32   : > { %352 = vmatprep.subr.bf16.mxu0 %v3943_v1 }
  0x35   : > { %353 = vmatpush2.bf16.msra.mxu0 %v3809_v13 }
  0x36   : > { %354 = vmatprep.subr.bf16.mxu0 %v3943_v1 }
  0x39   : > { %355 = vmatpush2.bf16.msra.mxu0 %v3810_v14 }
  0x3a   : > { %3569 = vmatprep.subr.bf16.mxu0 %v3944_v30 }
  0x3c   : > { %357 = vmatmul.mubr.bf16.vlgmr.msra.gmra.mxu0 %v245_v16 }
  0x3d   : > { %3573 = vmatprep.mubr.msk.bf16.mxu0 %vm3945_vm2, %v3944_v30 }
  0xfc   : > { %v358_v18 = vpop.f32.mrf.mxu0 }
  0xfd   : > { %v4035_v19 = vadd.f32 %v358_v18, %v247_v17  ;;  %v3813_v17 = vld [vmem:[%s4745_s2 + $0x78] sm:$0xff]   ;;  %v3814_v18 = vld [vmem:[%s4745_s2 + $0x70] sm:$0xff]  }
  0xfe   : > { %v360_v20 = vpop.f32.mrf.mxu0 }
  0xff   : > { %v367_v21 = vsel %vm366_vm1, %v4035_v19, 0.0 }
 0x100   : > { %v361_v22 = vpop.f32.mrf.mxu0  ;;  %368 = vadd.xlane.f32.xlu0 %v367_v21 }
 0x102   : > { %v362_v23 = vpop.f32.mrf.mxu0 }
 0x189   : > { %v369_v24 = vpop.xlane.xlu0 %368 }
 0x18a   : > { %v371_v25 = vmul.f32 0.03125, %v369_v24 }
 0x18c   : > { %v372_v26 = vsub.f32 %v4035_v19, %v371_v25 }
 0x18e   : > { %v373_v27 = vmul.f32 %v372_v26, %v372_v26 }
 0x190   : > { %v374_v28 = vsel %vm366_vm1, %v373_v27, 0.0 }
 0x191   : > { %375 = vadd.xlane.f32.xlu0 %v374_v28  ;;  %v3309_v28 = vld [vmem:[%s4746_s3 + $0x20] ss:$0 sm:$0xff] }
 0x21a   : > { %v376_v32 = vpop.xlane.xlu0 %375 }
 0x21b   : > { %v377_v33 = vmul.f32 0.03125, %v376_v32 }
 0x21d   : > { %v378_v34 = vadd.f32 1e-12, %v377_v33 }
 0x21f   : > { %3839 = vrsqrt.f32 %v378_v34 }
 0x22c   : > { %v3840_v35 = vpop.eup %3839 }
 0x22d   : > { %v380_v37 = vmul.f32 %v3840_v35, %v372_v26 }
 0x22f   : > { %v385_v39 = vmul.f32 %v3294_v36, %v380_v37 }
 0x231   : > { %v390_v40 = vadd.f32 %v3295_v38, %v385_v39 }
 0x233   : > { %v395_v41 = vpack.c.bf16 %v390_v40, %v390_v40 }
 0x235   : > { %3510 = vmatmul.mubr.msk.bf16.vlgmr.msra.gmra.mxu1 %vm366_vm1, %v395_v41  ;;  %v3816_v41 = vld [vmem:[%s4745_s2 + $0x80] sm:$0xff]  }
 0x236   : > { %3515 = vmatprep.mubr.msk.f32.mxu1 %vm3945_vm2, %v3944_v30 }
 0x2f5   : > { %v450_v43 = vpop.f32.mrf.mxu1 }
 0x2f6   : > { %v451_v44 = vadd.f32 %v3296_v42, %v450_v43 }
 0x2f7   : > { %v3511_v45 = vpop.f32.mrf.mxu1 }
 0x2f8   : > { %457 = vrot.lane.b32.xlu1 %v451_v44, %s3946_s7 }
 0x2f9   : > { %v453_v46 = vpop.f32.mrf.mxu1 }
 0x2fa   : > { %v3310_v46 = vld [vmem:[%s4746_s3 + $0x28] ss:$0 sm:$0xff] }
 0x2fb   : > { %v3512_v47 = vpop.f32.mrf.mxu1 }
 0x2fc   : > { %459 = vrot.lane.b32.xlu1 %v451_v44, %s3947_s8 }
 0x36a   : > { %v458_v48 = vpop.permute.xlu1 %457 }
 0x36b   : > { %536 = vrot.lane.b32.xlu0 %v458_v48, %s3947_s8 }
 0x36e   : > { %v460_v49 = vpop.permute.xlu1 %459 }
 0x36f   : > { %3514 = vmatpush3.xpose.msk.msra.mxu1 %vm461_vm3, %v460_v49 }
 0x370   : > { %3518 = vmatprep.subr.mxu1 %v3944_v30 }
 0x372   : > { %3516 = vmatmul.mubr.msk.f32.vlgmr.msra.gmra.mxu1 %vm461_vm3, %v451_v44 }
 0x373   : > { %3520 = vmatprep.mubr.msk.f32.mxu1 %vm3945_vm2, %v3944_v30 }
 0x3dd   : > { %v537_v50 = vpop.permute.xlu0 %536 }
 0x3de   : > { %3519 = vmatpush3.xpose.msk.msra.mxu1 %vm461_vm3, %v537_v50 }
 0x3df   : > { %3523 = vmatprep.subr.mxu1 %v3944_v30 }
 0x3e1   : > { %3521 = vmatmul.mubr.msk.f32.vlgmr.msra.gmra.mxu1 %vm461_vm3, %v458_v48 }
 0x3e2   : > { %3525 = vmatprep.mubr.msk.f32.mxu1 %vm3945_vm2, %v3944_v30 }
 0x432   : > { %v532_v53 = vpop.f32.mrf.mxu1 }
 0x433   : > { %v612_v54 = vmul.f32 0.25, %v532_v53 }
 0x434   : > { %v3517_v55 = vpop.f32.mrf.mxu1 }
 0x435   : > { %v616_v56 = vsel %vm213_vm4, %v612_v54, -1e+30  ;;  %v3817_v54 = vld [vmem:[%s4745_s2 + $0xc8] sm:$0xff]   ;;  %v3818_v55 = vld [vmem:[%s4745_s2 + $0xc0] sm:$0xff]  }
 0x436   : > { %v619_v57 = vsel %vm618_vm5, %v616_v56, -inf }
 0x437   : > { %620 = vmax.xlane.f32.xlu1 %v619_v57  ;;  %v3820_v57 = vld [vmem:[%s4745_s2 + $0xb0] sm:$0xff]  }
 0x4a1   : > { %v608_v58 = vpop.f32.mrf.mxu1 }
 0x4a2   : > { %v613_v59 = vmul.f32 0.25, %v608_v58  ;;  %v3821_v58 = vld [vmem:[%s4745_s2 + $0xa8] sm:$0xff]  }
 0x4a3   : > { %v3522_v60 = vpop.f32.mrf.mxu1 }
 0x4a4   : > { %v617_v61 = vsel %vm213_vm4, %v613_v59, -1e+30  ;;  %v3822_v59 = vld [vmem:[%s4745_s2 + $0xa0] sm:$0xff]   ;;  %v3823_v60 = vld [vmem:[%s4745_s2 + $0x98] sm:$0xff]  }
 0x4a5   : > { %v622_v62 = vsel %vm618_vm5, %v617_v61, -inf }
 0x4a6   : > { %623 = vmax.xlane.f32.xlu0 %v622_v62  ;;  %v3312_v62 = vld [vmem:[%s4746_s3 + $0x38] ss:$0 sm:$0xff] }
 0x4bc   : > { %717 = vrot.lane.b32.xlu0 %v458_v48, %s3948_s9  ;;  %v3311_v48 = vld [vmem:[%s4746_s3 + $0x30] ss:$0 sm:$0xff] }
 0x4c0   : > { %v621_v63 = vpop.xlane.xlu1 %620 }
 0x4c1   : > { %v625_v0 = vsub.f32 %v616_v56, %v621_v63  ;;  %v3819_v56 = vld [vmem:[%s4745_s2 + $0xb8] sm:$0xff]  }
 0x4c3   : > { %v627_v1 = vmul.f32 1.442695, %v625_v0 }
 0x4c5   : > { %3841 = vpow2.f32 %v627_v1 }
 0x4d2   : > { %v3842_v2 = vpop.eup %3841 }
 0x4d3   : > { %v631_v3 = vsel %vm618_vm5, %v3842_v2, 0.0 }
 0x4d4   : > { %632 = vadd.xlane.f32.xlu1 %v631_v3 }
 0x52f   : > { %v624_v4 = vpop.xlane.xlu0 %623 }
 0x530   : > { %v626_v5 = vsub.f32 %v617_v61, %v624_v4  ;;  %v3824_v61 = vld [vmem:[%s4745_s2 + $0x90] sm:$0xff]  }
 0x532   : > { %v629_v6 = vmul.f32 1.442695, %v626_v5 }
 0x533   : > { %v718_v14 = vpop.permute.xlu0 %717 }
 0x534   : > { %3843 = vpow2.f32 %v629_v6 }
 0x541   : > { %v3844_v7 = vpop.eup %3843 }
 0x542   : > { %v634_v8 = vsel %vm618_vm5, %v3844_v7, 0.0 }
 0x543   : > { %635 = vadd.xlane.f32.xlu1 %v634_v8 }
 0x554   : > { %641 = vrot.lane.b32.xlu1 %v451_v44, %s3948_s9 }
 0x55d   : > { %v633_v9 = vpop.xlane.xlu1 %632 }
 0x55e   : > { %3845 = vrcp.f32 %v633_v9 }
 0x56b   : > { %v3846_v11 = vpop.eup %3845 }
 0x56c   : > { %v638_v13 = vmul.f32 %v3846_v11, %v3842_v2 }
 0x5cc   : > { %v636_v10 = vpop.xlane.xlu1 %635 }
 0x5cd   : > { %3847 = vrcp.f32 %v636_v10 }
 0x5d0   : > { %v642_v12 = vpop.permute.xlu1 %641 }
 0x5d1   : > { %3524 = vmatpush3.msra.mxu1 %v642_v12 }
 0x5d2   : > { %3526 = vmatmul.mubr.msk.f32.vlgmr.msra.gmra.mxu1 %vm618_vm5, %v638_v13  ;;  %3528 = vmatprep.subr.mxu1 %v3944_v30 }
 0x5d3   : > { %3529 = vmatpush3.msra.mxu1 %v718_v14  ;;  %3530 = vmatprep.mubr.msk.f32.mxu1 %vm3945_vm2, %v3944_v30 }
 0x5d4   : > { %3533 = vmatprep.subr.bf16.mxu1 %v3944_v30 }
 0x5da   : > { %v3848_v15 = vpop.eup %3847 }
 0x5db   : > { %v640_v16 = vmul.f32 %v3848_v15, %v3844_v7  ;;  %v3324_v15 = vld [vmem:[%s4746_s3 + $0x40] ss:$0 sm:$0xff] }
 0x5dd   : > { %3531 = vmatmul.mubr.msk.f32.vlgmr.msra.gmra.mxu1 %vm618_vm5, %v640_v16 }
 0x5de   : > { %3537 = vmatprep.mubr.msk.bf16.mxu1 %vm3945_vm2, %v3944_v30  ;;  %3534 = vmatpush3.bf16.msra.mxu1 %v3813_v17 }
 0x5df   : > { %3535 = vmatprep.subr.bf16.mxu1 %v3944_v30 }
 0x5e2   : > { %3536 = vmatpush3.bf16.msra.mxu1 %v3814_v18 }
 0x5e3   : > { %3541 = vmatprep.subr.bf16.mxu1 %v3944_v30 }
 0x692   : > { %v713_v20 = vpop.f32.mrf.mxu1 }
 0x694   : > { %v3527_v21 = vpop.f32.mrf.mxu1 }
 0x69d   : > { %v789_v22 = vpop.f32.mrf.mxu1 }
 0x69e   : > { %794 = vrot.lane.b32.xlu1 %v789_v22, %s3949_s14 }
 0x69f   : > { %v3532_v23 = vpop.f32.mrf.mxu1 }
 0x710   : > { %v795_v24 = vpop.permute.xlu1 %794 }
 0x711   : > { %v797_v25 = vsel %vm461_vm3, %v713_v20, %v795_v24 }
 0x712   : > { %v802_v26 = vpack.c.bf16 %v797_v25, %v797_v25 }
 0x714   : > { %3538 = vmatmul.mubr.msk.bf16.vlgmr.msra.gmra.mxu1 %vm366_vm1, %v802_v26 }
 0x715   : > { %3545 = vmatprep.mubr.msk.bf16.mxu1 %vm3945_vm2, %v3944_v30 }
 0x7d4   : > { %v852_v27 = vpop.f32.mrf.mxu1 }
 0x7d5   : > { %v858_v29 = vadd.f32 %v852_v27, %v4035_v19  ;;  %v3815_v19 = vld [vmem:[%s4745_s2 + $0x88] sm:$0xff]  }
 0x7d6   : > { %v3539_v31 = vpop.f32.mrf.mxu1  ;;  %3542 = vmatpush3.bf16.msra.mxu1 %v3815_v19  ;;  %v3327_v19 = vld [vmem:[%s4746_s3 + $0x58] ss:$0 sm:$0xff] }
 0x7d7   : > { %v4119_v32 = vadd.f32 %v3309_v28, %v858_v29  ;;  %3543 = vmatprep.subr.bf16.mxu1 %v3944_v30  ;;  %v3825_v28 = vld [vmem:[%s4745_s2 + $0xd8] sm:$0xff]   ;;  %v3826_v29 = vld [vmem:[%s4745_s2 + $0xd0] sm:$0xff]  }
 0x7d8   : > { %v855_v33 = vpop.f32.mrf.mxu1  ;;  %3570 = vmatpush3.bf16.msra.mxu0 %v3825_v28 }
 0x7d9   : > { %v867_v34 = vsel %vm366_vm1, %v4119_v32, 0.0  ;;  %3571 = vmatprep.subr.bf16.mxu0 %v3944_v30 }
 0x7da   : > { %868 = vadd.xlane.f32.xlu1 %v867_v34  ;;  %v3540_v35 = vpop.f32.mrf.mxu1  ;;  %3544 = vmatpush3.bf16.msra.mxu1 %v3816_v41 }
 0x7db   : > { %3549 = vmatprep.subr.bf16.mxu1 %v3944_v30  ;;  %v3325_v35 = vld [vmem:[%s4746_s3 + $0x48] ss:$0 sm:$0xff] }
 0x7dc   : > { %3572 = vmatpush3.bf16.msra.mxu0 %v3826_v29 }
 0x7dd   : > { %3577 = vmatprep.subr.mxu0 %v3944_v30 }
 0x863   : > { %v869_v36 = vpop.xlane.xlu1 %868 }
 0x864   : > { %v870_v37 = vmul.f32 0.03125, %v869_v36 }
 0x866   : > { %v871_v38 = vsub.f32 %v4119_v32, %v870_v37  ;;  %v3326_v37 = vld [vmem:[%s4746_s3 + $0x50] ss:$0 sm:$0xff] }
 0x868   : > { %v872_v39 = vmul.f32 %v871_v38, %v871_v38 }
 0x86a   : > { %v873_v40 = vsel %vm366_vm1, %v872_v39, 0.0 }
 0x86b   : > { %874 = vadd.xlane.f32.xlu0 %v873_v40 }
 0x8f4   : > { %v875_v42 = vpop.xlane.xlu0 %874 }
 0x8f5   : > { %v876_v43 = vmul.f32 0.03125, %v875_v42 }
 0x8f7   : > { %v877_v44 = vadd.f32 1e-12, %v876_v43 }
 0x8f9   : > { %3849 = vrsqrt.f32 %v877_v44 }
 0x906   : > { %v3850_v45 = vpop.eup %3849 }
 0x907   : > { %v879_v47 = vmul.f32 %v3850_v45, %v871_v38 }
 0x909   : > { %v884_v49 = vmul.f32 %v3310_v46, %v879_v47 }
 0x90b   : > { %v889_v50 = vadd.f32 %v3311_v48, %v884_v49 }
 0x90d   : > { %v894_v53 = vpack.c.bf16 %v889_v50, %v889_v50 }
 0x90f   : > { %3546 = vmatmul.mubr.msk.bf16.vlgmr.msra.gmra.mxu1 %vm366_vm1, %v894_v53 }
 0x910   : > { %3565 = vmatprep.mubr.msk.bf16.mxu1 %vm3945_vm2, %v3944_v30  ;;  %3550 = vmatpush3.bf16.msra.mxu1 %v3817_v54 }
 0x911   : > { %3551 = vmatprep.subr.bf16.mxu1 %v3944_v30 }
 0x914   : > { %3552 = vmatpush3.bf16.msra.mxu1 %v3818_v55 }
 0x915   : > { %3553 = vmatprep.subr.bf16.mxu1 %v3944_v30 }
 0x918   : > { %3554 = vmatpush3.bf16.msra.mxu1 %v3819_v56 }
 0x919   : > { %3555 = vmatprep.subr.bf16.mxu1 %v3944_v30 }
 0x91c   : > { %3556 = vmatpush3.bf16.msra.mxu1 %v3820_v57 }
 0x91d   : > { %3557 = vmatprep.subr.bf16.mxu1 %v3944_v30 }
 0x920   : > { %3558 = vmatpush3.bf16.msra.mxu1 %v3821_v58 }
 0x921   : > { %3559 = vmatprep.subr.bf16.mxu1 %v3944_v30 }
 0x924   : > { %3560 = vmatpush3.bf16.msra.mxu1 %v3822_v59 }
 0x925   : > { %3561 = vmatprep.subr.bf16.mxu1 %v3944_v30 }
 0x928   : > { %3562 = vmatpush3.bf16.msra.mxu1 %v3823_v60 }
 0x929   : > { %3563 = vmatprep.subr.bf16.mxu1 %v3944_v30 }
 0x92c   : > { %3564 = vmatpush3.bf16.msra.mxu1 %v3824_v61 }
 0x92d   : > { %3605 = vmatprep.subr.bf16.mxu1 %v3944_v30 }
 0x9cf   : > { %v949_v63 = vpop.f32.mrf.mxu1 }
 0x9d0   : > { %v950_v0 = vadd.f32 %v3312_v62, %v949_v63 }
 0x9d1   : > { %v3547_v1 = vpop.f32.mrf.mxu1 }
 0x9d2   : > { %v955_v2 = vmul.f32 %v950_v0, %v950_v0 }
 0x9d3   : > { %v952_v3 = vpop.f32.mrf.mxu1 }
 0x9d4   : > { %v956_v4 = vmul.f32 %v955_v2, %v950_v0 }
 0x9d5   : > { %v3548_v5 = vpop.f32.mrf.mxu1 }
 0x9d6   : > { %v957_v6 = vmul.f32 0.044715, %v956_v4 }
 0x9d8   : > { %v958_v7 = vadd.f32 %v957_v6, %v950_v0 }
 0x9da   : > { %v959_v8 = vmul.f32 0.7978846, %v958_v7 }
 0x9dc   : > { %3851 = vtanh.f32 %v959_v8 }
 0x9e9   : > { %v3852_v9 = vpop.eup %3851 }
 0x9ea   : > { %v961_v10 = vadd.f32 1.0, %v3852_v9 }
 0x9ec   : > { %v962_v11 = vmul.f32 0.5, %v961_v10 }
 0x9ee   : > { %v963_v12 = vmul.f32 %v962_v11, %v950_v0 }
 0x9f0   : > { %v980_v13 = vpack.c.bf16 %v963_v12, %v963_v12 }
 0x9f2   : > { %3566 = vmatmul.mubr.bf16.vlgmr.msra.gmra.mxu1 %v980_v13 }
 0x9f3   : > { %3609 = vmatprep.mubr.msk.bf16.mxu1 %vm3945_vm2, %v3944_v30 }
 0xab2   : > { %v1063_v14 = vpop.f32.mrf.mxu1 }
 0xab3   : > { %v1069_v16 = vadd.f32 %v1063_v14, %v4119_v32  ;;  %v3827_v14 = vld [vmem:[%s4745_s2 + $0xe8] sm:$0xff]  }
 0xab4   : > { %v3567_v17 = vpop.f32.mrf.mxu1 }
 0xab5   : > { %v4183_v18 = vadd.f32 %v3324_v15, %v1069_v16  ;;  %v3828_v17 = vld [vmem:[%s4745_s2 + $0xe0] sm:$0xff]  }
 0xab6   : > { %v1066_v20 = vpop.f32.mrf.mxu1 }
 0xab7   : > { %v1078_v21 = vsel %vm366_vm1, %v4183_v18, 0.0 }
 0xab8   : > { %1079 = vadd.xlane.f32.xlu1 %v1078_v21  ;;  %v3568_v22 = vpop.f32.mrf.mxu1 }
 0xb41   : > { %v1080_v23 = vpop.xlane.xlu1 %1079 }
 0xb42   : > { %v1081_v24 = vmul.f32 0.03125, %v1080_v23 }
 0xb44   : > { %v1082_v25 = vsub.f32 %v4183_v18, %v1081_v24 }
 0xb46   : > { %v1083_v26 = vmul.f32 %v1082_v25, %v1082_v25 }
 0xb48   : > { %v1084_v27 = vsel %vm366_vm1, %v1083_v26, 0.0  ;;  %v3340_v26 = vld [vmem:[%s4746_s3 + $0x60] ss:$0 sm:$0xff] }
 0xb49   : > { %1085 = vadd.xlane.f32.xlu1 %v1084_v27 }
 0xbd2   : > { %v1086_v31 = vpop.xlane.xlu1 %1085 }
 0xbd3   : > { %v1087_v32 = vmul.f32 0.03125, %v1086_v31 }
 0xbd5   : > { %v1088_v33 = vadd.f32 1e-12, %v1087_v32 }
 0xbd7   : > { %3853 = vrsqrt.f32 %v1088_v33 }
 0xbe4   : > { %v3854_v34 = vpop.eup %3853 }
 0xbe5   : > { %v1090_v36 = vmul.f32 %v3854_v34, %v1082_v25 }
 0xbe7   : > { %v1095_v38 = vmul.f32 %v3325_v35, %v1090_v36 }
 0xbe9   : > { %v1100_v39 = vadd.f32 %v3326_v37, %v1095_v38 }
 0xbeb   : > { %v1105_v40 = vpack.c.bf16 %v1100_v39, %v1100_v39  ;;  %v3830_v39 = vld [vmem:[%s4745_s2 + $0xf0] sm:$0xff]  }
 0xbed   : > { %3574 = vmatmul.mubr.msk.bf16.vlgmr.msra.gmra.mxu0 %vm366_vm1, %v1105_v40 }
 0xbee   : > { %3579 = vmatprep.mubr.msk.f32.mxu0 %vm3945_vm2, %v3944_v30 }
 0xcad   : > { %v1160_v41 = vpop.f32.mrf.mxu0 }
 0xcae   : > { %v1161_v42 = vadd.f32 %v3327_v19, %v1160_v41 }
 0xcaf   : > { %v3575_v43 = vpop.f32.mrf.mxu0 }
 0xcb0   : > { %1169 = vrot.lane.b32.xlu1 %v1161_v42, %s3947_s8  ;;  %1167 = vrot.lane.b32.xlu0 %v1161_v42, %s3946_s7  ;;  %v3341_v43 = vld [vmem:[%s4746_s3 + $0x68] ss:$0 sm:$0xff] }
 0xcb1   : > { %v1163_v44 = vpop.f32.mrf.mxu0 }
 0xcb3   : > { %v3576_v45 = vpop.f32.mrf.mxu0 }
 0xcb4   : > { %v3342_v45 = vld [vmem:[%s4746_s3 + $0x70] ss:$0 sm:$0xff] }
 0xd22   : > { %v1170_v46 = vpop.permute.xlu1 %1169  ;;  %v1168_v47 = vpop.permute.xlu0 %1167 }
 0xd23   : > { %3578 = vmatpush3.xpose.msk.msra.mxu0 %vm461_vm3, %v1170_v46  ;;  %1245 = vrot.lane.b32.xlu1 %v1168_v47, %s3947_s8 }
 0xd24   : > { %3582 = vmatprep.subr.mxu0 %v3944_v30 }
 0xd26   : > { %3580 = vmatmul.mubr.msk.f32.vlgmr.msra.gmra.mxu0 %vm461_vm3, %v1161_v42 }
 0xd27   : > { %3584 = vmatprep.mubr.msk.f32.mxu0 %vm3945_vm2, %v3944_v30 }
 0xd95   : > { %v1246_v48 = vpop.permute.xlu1 %1245 }
 0xd96   : > { %3583 = vmatpush3.xpose.msk.msra.mxu0 %vm461_vm3, %v1246_v48 }
 0xd97   : > { %3587 = vmatprep.subr.mxu0 %v3944_v30 }
 0xd99   : > { %3585 = vmatmul.mubr.msk.f32.vlgmr.msra.gmra.mxu0 %vm461_vm3, %v1168_v47 }
 0xd9a   : > { %3589 = vmatprep.mubr.msk.f32.mxu0 %vm3945_vm2, %v3944_v30 }
 0xde6   : > { %v1241_v49 = vpop.f32.mrf.mxu0 }
 0xde7   : > { %v1321_v50 = vmul.f32 0.25, %v1241_v49  ;;  %v3831_v49 = vld [vmem:[%s4745_s2 + $0x138] sm:$0xff]  }
 0xde8   : > { %v3581_v53 = vpop.f32.mrf.mxu0 }
 0xde9   : > { %v1323_v54 = vsel %vm213_vm4, %v1321_v50, -1e+30  ;;  %v3832_v50 = vld [vmem:[%s4745_s2 + $0x130] sm:$0xff]   ;;  %v3833_v53 = vld [vmem:[%s4745_s2 + $0x128] sm:$0xff]  }
 0xdea   : > { %v1325_v55 = vsel %vm618_vm5, %v1323_v54, -inf }
 0xdeb   : > { %1326 = vmax.xlane.f32.xlu0 %v1325_v55  ;;  %v3835_v55 = vld [vmem:[%s4745_s2 + $0x118] sm:$0xff]  }
 0xe59   : > { %v1317_v56 = vpop.f32.mrf.mxu0 }
 0xe5a   : > { %v1322_v57 = vmul.f32 0.25, %v1317_v56  ;;  %v3836_v56 = vld [vmem:[%s4745_s2 + $0x110] sm:$0xff]  }
 0xe5b   : > { %v3586_v58 = vpop.f32.mrf.mxu0 }
 0xe5c   : > { %v1324_v59 = vsel %vm213_vm4, %v1322_v57, -1e+30  ;;  %v3837_v57 = vld [vmem:[%s4745_s2 + $0x108] sm:$0xff]   ;;  %v3838_v58 = vld [vmem:[%s4745_s2 + $0x100] sm:$0xff]  }
 0xe5d   : > { %v1328_v60 = vsel %vm618_vm5, %v1324_v59, -inf }
 0xe5e   : > { %1329 = vmax.xlane.f32.xlu1 %v1328_v60 }
 0xe6f   : > { %1347 = vrot.lane.b32.xlu1 %v1161_v42, %s3948_s9 }
 0xe74   : > { %v1327_v61 = vpop.xlane.xlu0 %1326 }
 0xe75   : > { %v1331_v62 = vsub.f32 %v1323_v54, %v1327_v61  ;;  %v3834_v54 = vld [vmem:[%s4745_s2 + $0x120] sm:$0xff]  }
 0xe77   : > { %v1333_v63 = vmul.f32 1.442695, %v1331_v62 }
 0xe79   : > { %3855 = vpow2.f32 %v1333_v63 }
 0xe86   : > { %v3856_v0 = vpop.eup %3855 }
 0xe87   : > { %v1337_v1 = vsel %vm618_vm5, %v3856_v0, 0.0 }
 0xe88   : > { %1338 = vadd.xlane.f32.xlu0 %v1337_v1 }
 0xee7   : > { %v1330_v2 = vpop.xlane.xlu1 %1329 }
 0xee8   : > { %v1332_v3 = vsub.f32 %v1324_v59, %v1330_v2  ;;  %v3343_v59 = vld [vmem:[%s4746_s3 + $0x78] ss:$0 sm:$0xff] }
 0xeea   : > { %v1335_v4 = vmul.f32 1.442695, %v1332_v3 }
 0xeeb   : > { %v1348_v5 = vpop.permute.xlu1 %1347 }
 0xeec   : > { %3857 = vpow2.f32 %v1335_v4  ;;  %3588 = vmatpush3.msra.mxu0 %v1348_v5 }
 0xeed   : > { %3592 = vmatprep.subr.mxu0 %v3944_v30 }
 0xef9   : > { %v3858_v52 = vpop.eup %3857 }
 0xefa   : > { %v1340_v6 = vsel %vm618_vm5, %v3858_v52, 0.0 }
 0xefb   : > { %1341 = vadd.xlane.f32.xlu0 %v1340_v6 }
 0xf11   : > { %v1339_v7 = vpop.xlane.xlu0 %1338  ;;  %1423 = vrot.lane.b32.xlu0 %v1168_v47, %s3948_s9 }
 0xf12   : > { %3859 = vrcp.f32 %v1339_v7 }
 0xf1f   : > { %v3860_v8 = vpop.eup %3859 }
 0xf20   : > { %v1344_v9 = vmul.f32 %v3860_v8, %v3856_v0 }
 0xf22   : > { %3590 = vmatmul.mubr.msk.f32.vlgmr.msra.gmra.mxu0 %vm618_vm5, %v1344_v9 }
 0xf23   : > { %3594 = vmatprep.mubr.msk.f32.mxu0 %vm3945_vm2, %v3944_v30 }
 0xf84   : > { %v1342_v10 = vpop.xlane.xlu0 %1341 }
 0xf85   : > { %3861 = vrcp.f32 %v1342_v10 }
 0xf88   : > { %v1424_v11 = vpop.permute.xlu0 %1423 }
 0xf89   : > { %3593 = vmatpush3.msra.mxu0 %v1424_v11  ;;  %v3355_v11 = vld [vmem:[%s4746_s3 + $0x80] ss:$0 sm:$0xff] }
 0xf8a   : > { %3597 = vmatprep.subr.bf16.mxu0 %v3944_v30 }
 0xf92   : > { %v3862_v12 = vpop.eup %3861 }
 0xf93   : > { %v1346_v13 = vmul.f32 %v3862_v12, %v3858_v52 }
 0xf95   : > { %3595 = vmatmul.mubr.msk.f32.vlgmr.msra.gmra.mxu0 %vm618_vm5, %v1346_v13 }
 0xf96   : > { %3601 = vmatprep.mubr.msk.bf16.mxu0 %vm3945_vm2, %v3944_v30  ;;  %3598 = vmatpush3.bf16.msra.mxu0 %v3827_v14 }
 0xf97   : > { %3599 = vmatprep.subr.bf16.mxu0 %v3944_v30 }
 0xf9a   : > { %3600 = vmatpush3.bf16.msra.mxu0 %v3828_v17 }
 0xf9b   : > { %3613 = vmatprep.subr.bf16.mxu0 %v3944_v30 }
 0xfe2   : > { %v1419_v15 = vpop.f32.mrf.mxu0 }
 0xfe4   : > { %v3591_v16 = vpop.f32.mrf.mxu0 }
0x1055   : > { %v1495_v20 = vpop.f32.mrf.mxu0 }
0x1056   : > { %1500 = vrot.lane.b32.xlu1 %v1495_v20, %s3949_s14 }
0x1057   : > { %v3596_v21 = vpop.f32.mrf.mxu0 }
0x10c8   : > { %v1501_v22 = vpop.permute.xlu1 %1500 }
0x10c9   : > { %v1503_v23 = vsel %vm461_vm3, %v1419_v15, %v1501_v22 }
0x10ca   : > { %v1508_v24 = vpack.c.bf16 %v1503_v23, %v1503_v23 }
0x10cc   : > { %3602 = vmatmul.mubr.msk.bf16.vlgmr.msra.gmra.mxu0 %vm366_vm1, %v1508_v24 }
0x10cd   : > { %3629 = vmatprep.mubr.msk.bf16.mxu0 %vm3945_vm2, %v3944_v30  ;;  %3614 = vmatpush3.bf16.msra.mxu0 %v3831_v49  ;;  %v1895_v49 = vld [vmem:[%s4746_s3 + $0x120] sm:$0xff] }
0x10ce   : > { %3615 = vmatprep.subr.bf16.mxu0 %v3944_v30 }
0x10d1   : > { %3616 = vmatpush3.bf16.msra.mxu0 %v3832_v50  ;;  %v1894_v50 = vld [vmem:[%s4746_s3 + $0x118] sm:$0xff] }
0x10d2   : > { %3617 = vmatprep.subr.bf16.mxu0 %v3944_v30 }
0x10d5   : > { %3618 = vmatpush3.bf16.msra.mxu0 %v3833_v53  ;;  %v4382_v53 = vld [vmem:[%s4746_s3 + $0xd0] sm:$0x3] }
0x10d6   : > { %3619 = vmatprep.subr.bf16.mxu0 %v3944_v30 }
0x10d9   : > { %3620 = vmatpush3.bf16.msra.mxu0 %v3834_v54  ;;  %v4387_v54 = vld [vmem:[%s4746_s3 + $0xc8] sm:$0xff] }
0x10da   : > { %3621 = vmatprep.subr.bf16.mxu0 %v3944_v30 }
0x10dd   : > { %3622 = vmatpush3.bf16.msra.mxu0 %v3835_v55  ;;  %v4397_v55 = vld [vmem:[%s4746_s3 + $0xc0] sm:$0xff] }
0x10de   : > { %3623 = vmatprep.subr.bf16.mxu0 %v3944_v30 }
0x10e1   : > { %3624 = vmatpush3.bf16.msra.mxu0 %v3836_v56  ;;  %v1820_v56 = vld [vmem:[%s4746_s3 + $0xb8] sm:$0x1] }
0x10e2   : > { %3625 = vmatprep.subr.bf16.mxu0 %v3944_v30 }
0x10e5   : > { %3626 = vmatpush3.bf16.msra.mxu0 %v3837_v57 }
0x10e6   : > { %3627 = vmatprep.subr.bf16.mxu0 %v3944_v30 }
0x10e9   : > { %3628 = vmatpush3.bf16.msra.mxu0 %v3838_v58 }
0x10ea   : > { %3682 = vmatprep.subr.mxu0 %v3944_v30 }
0x118c   : > { %v1558_v25 = vpop.f32.mrf.mxu0 }
0x118d   : > { %v1564_v27 = vadd.f32 %v1558_v25, %v4183_v18  ;;  %v3829_v18 = vld [vmem:[%s4745_s2 + $0xf8] sm:$0xff]   ;;  %v1819_v25 = vld [vmem:[%s4746_s3 + $0xb0] sm:$0xff] }
0x118e   : > { %v3603_v28 = vpop.f32.mrf.mxu0  ;;  %3606 = vmatpush3.bf16.msra.mxu1 %v3829_v18 }
0x118f   : > { %v4257_v29 = vadd.f32 %v3340_v26, %v1564_v27  ;;  %3607 = vmatprep.subr.bf16.mxu1 %v3944_v30  ;;  %v1818_v26 = vld [vmem:[%s4746_s3 + $0xa8] sm:$0xff]  ;;  %v1817_v27 = vld [vmem:[%s4746_s3 + $0xa0] sm:$0xff]  ;;  %v1816_v28 = vld [vmem:[%s4746_s3 + $0x98] sm:$0xff] }
0x1190   : > { %v1561_v31 = vpop.f32.mrf.mxu0 }
0x1191   : > { %v1573_v32 = vsel %vm366_vm1, %v4257_v29, 0.0 }
0x1192   : > { %1574 = vadd.xlane.f32.xlu1 %v1573_v32  ;;  %v3604_v33 = vpop.f32.mrf.mxu0  ;;  %3608 = vmatpush3.bf16.msra.mxu1 %v3830_v39 }
0x1193   : > { %3633 = vmatprep.subr.mxu1 %v3944_v30  ;;  %v4340_v33 = vshrl.u32 %v211_v51, 7 }
0x1195   : > { %vm216_vm6 = vcmp.lt.s32.totalorder %v4340_v33, 5 }
0x1196   : > { %v3280_v18 = vsel %vm216_vm6, 1.0, %v3944_v30 }
0x121b   : > { %v1575_v34 = vpop.xlane.xlu1 %1574 }
0x121c   : > { %v1576_v35 = vmul.f32 0.03125, %v1575_v34 }
0x121e   : > { %v1577_v36 = vsub.f32 %v4257_v29, %v1576_v35  ;;  %v3356_v35 = vld [vmem:[%s4746_s3 + $0x88] ss:$0 sm:$0xff] }
0x1220   : > { %v1578_v37 = vmul.f32 %v1577_v36, %v1577_v36 }
0x1222   : > { %v1579_v38 = vsel %vm366_vm1, %v1578_v37, 0.0  ;;  %v3357_v37 = vld [vmem:[%s4746_s3 + $0x90] ss:$0 sm:$0xff] }
0x1223   : > { %1580 = vadd.xlane.f32.xlu0 %v1579_v38 }
0x12ac   : > { %v1581_v40 = vpop.xlane.xlu0 %1580 }
0x12ad   : > { %v1582_v19 = vmul.f32 0.03125, %v1581_v40 }
0x12af   : > { %v1583_v41 = vadd.f32 1e-12, %v1582_v19 }
0x12b1   : > { %3863 = vrsqrt.f32 %v1583_v41 }
0x12be   : > { %v3864_v42 = vpop.eup %3863 }
0x12bf   : > { %v1585_v44 = vmul.f32 %v3864_v42, %v1577_v36 }
0x12c1   : > { %v1590_v46 = vmul.f32 %v3341_v43, %v1585_v44 }
0x12c3   : > { %v1595_v47 = vadd.f32 %v3342_v45, %v1590_v46 }
0x12c5   : > { %v1600_v48 = vpack.c.bf16 %v1595_v47, %v1595_v47  ;;  %v1897_v47 = vld [vmem:[%s4746_s3 + $0x130] sm:$0xff] }
0x12c7   : > { %3610 = vmatmul.mubr.msk.bf16.vlgmr.msra.gmra.mxu1 %vm366_vm1, %v1600_v48  ;;  %v1896_v48 = vld [vmem:[%s4746_s3 + $0x128] sm:$0xff] }
0x12c8   : > { %3641 = vmatprep.mubr.msk.f32.mxu1 %vm3945_vm2, %v3944_v30  ;;  %3634 = vmatpush3.msra.mxu1 %v1819_v25 }
0x12c9   : > { %3635 = vmatprep.subr.mxu1 %v3944_v30 }
0x12ca   : > { %3636 = vmatpush3.msra.mxu1 %v1818_v26  ;;  %v4466_v26 = vld [vmem:[%s4746_s3 + $0x100] sm:$0x1] }
0x12cb   : > { %3637 = vmatprep.subr.mxu1 %v3944_v30 }
0x12cc   : > { %3638 = vmatpush3.msra.mxu1 %v1817_v27 }
0x12cd   : > { %3639 = vmatprep.subr.mxu1 %v3944_v30 }
0x12ce   : > { %3640 = vmatpush3.msra.mxu1 %v1816_v28 }
0x12cf   : > { %3644 = vmatprep.subr.mxu1 %v3944_v30 }
0x1387   : > { %v1655_v60 = vpop.f32.mrf.mxu1 }
0x1388   : > { %v1656_v61 = vadd.f32 %v3343_v59, %v1655_v60 }
0x1389   : > { %v3611_v62 = vpop.f32.mrf.mxu1 }
0x138a   : > { %v1661_v63 = vmul.f32 %v1656_v61, %v1656_v61  ;;  %v1991_v62 = vld [vmem:[%s205_s18] sm:$0x1] }
0x138b   : > { %v1658_v0 = vpop.f32.mrf.mxu1 }
0x138c   : > { %v1662_v1 = vmul.f32 %v1661_v63, %v1656_v61 }
0x138d   : > { %v3612_v2 = vpop.f32.mrf.mxu1 }
0x138e   : > { %v1663_v3 = vmul.f32 0.044715, %v1662_v1  ;;  %v4417_v1 = vld [vmem:[%s4746_s3 + $0xd8] sm:$0x1] }
0x1390   : > { %v1664_v4 = vadd.f32 %v1663_v3, %v1656_v61 }
0x1392   : > { %v1665_v5 = vmul.f32 0.7978846, %v1664_v4 }
0x1394   : > { %3865 = vtanh.f32 %v1665_v5 }
0x13a1   : > { %v3866_v52 = vpop.eup %3865 }
0x13a2   : > { %v1667_v6 = vadd.f32 1.0, %v3866_v52 }
0x13a4   : > { %v1668_v7 = vmul.f32 0.5, %v1667_v6 }
0x13a6   : > { %v1669_v8 = vmul.f32 %v1668_v7, %v1656_v61 }
0x13a8   : > { %v1686_v9 = vpack.c.bf16 %v1669_v8, %v1669_v8 }
0x13aa   : > { %3630 = vmatmul.mubr.bf16.vlgmr.msra.gmra.mxu0 %v1686_v9 }
0x13ab   : > { %3694 = vmatprep.mubr.msk.f32.mxu0 %vm3945_vm2, %v3944_v30 }
0x146a   : > { %v1769_v10 = vpop.f32.mrf.mxu0 }
0x146b   : > { %v1775_v12 = vadd.f32 %v1769_v10, %v4257_v29 }
0x146c   : > { %v3631_v13 = vpop.f32.mrf.mxu0 }
0x146d   : > { %v1781_v14 = vadd.f32 %v3355_v11, %v1775_v12 }
0x146e   : > { %v1772_v15 = vpop.f32.mrf.mxu0 }
0x146f   : > { %v1784_v16 = vsel %vm366_vm1, %v1781_v14, 0.0  ;;  %v4433_v15 = vld [vmem:[%s4746_s3 + $0xf0] sm:$0xff] }
0x1470   : > { %1785 = vadd.xlane.f32.xlu0 %v1784_v16  ;;  %v3632_v17 = vpop.f32.mrf.mxu0  ;;  %v4440_v16 = vld [vmem:[%s4746_s3 + $0xe8] sm:$0xff] }
0x14f9   : > { %v1786_v20 = vpop.xlane.xlu0 %1785 }
0x14fa   : > { %v1787_v21 = vmul.f32 0.03125, %v1786_v20  ;;  %v4451_v20 = vld [vmem:[%s4746_s3 + $0xe0] sm:$0xff] }
0x14fc   : > { %v1788_v22 = vsub.f32 %v1781_v14, %v1787_v21  ;;  %v4428_v14 = vld [vmem:[%s4746_s3 + $0xf8] sm:$0xff] }
0x14fe   : > { %v1789_v23 = vmul.f32 %v1788_v22, %v1788_v22 }
0x1500   : > { %v1790_v24 = vsel %vm366_vm1, %v1789_v23, 0.0 }
0x1501   : > { %1791 = vadd.xlane.f32.xlu1 %v1790_v24 }
0x158a   : > { %v1792_v29 = vpop.xlane.xlu1 %1791 }
0x158b   : > { %v1793_v31 = vmul.f32 0.03125, %v1792_v29 }
0x158d   : > { %v1794_v32 = vadd.f32 1e-12, %v1793_v31 }
0x158f   : > { %3867 = vrsqrt.f32 %v1794_v32 }
0x159c   : > { %v3868_v34 = vpop.eup %3867 }
0x159d   : > { %v1796_v36 = vmul.f32 %v3868_v34, %v1788_v22 }
0x159f   : > { %v1801_v38 = vmul.f32 %v3356_v35, %v1796_v36 }
0x15a1   : > { %v4352_v39 = vadd.f32 %v3357_v37, %v1801_v38 }
0x15a3   : > { %v1807_v51 = vmul.f32 %v3280_v18, %v4352_v39 }
0x15a5   : > { %v1808_v40 = vsel %vm366_vm1, %v1807_v51, 0.0 }
0x15a6   : > { %v1809_v19 = vrot.slane %v1808_v40, 4 }
0x15a8   : > { %v1810_v41 = vadd.f32 %v1809_v19, %v1808_v40  ;;  %v4477_v19 = vld [vmem:[%s4746_s3 + $0x110] sm:$0xff] }
0x15aa   : > { %v1811_v42 = vrot.slane %v1810_v41, 2 }
0x15ac   : > { %v1812_v43 = vadd.f32 %v1811_v42, %v1810_v41  ;;  %v4482_v41 = vld [vmem:[%s4746_s3 + $0x108] sm:$0xff] }
0x15ae   : > { %v1813_v44 = vrot.slane %v1812_v43, 1 }
0x15b0   : > { %v1814_v45 = vadd.f32 %v1813_v44, %v1812_v43 }
0x15b2   : > { %v1815_v46 = vmul.f32 0.2, %v1814_v45 }
0x15b4   : > { %3642 = vmatmul.mubr.msk.f32.vlgmr.msra.gmra.mxu1 %vm366_vm1, %v1815_v46  ;;  %v4508_v46 = vsub.s32 0, %v4340_v33 }
0x15b5   : > { %3645 = vmatpush3.msra.mxu1 %v1897_v47  ;;  %3652 = vmatprep.mubr.msk.f32.mxu1 %vm3945_vm2, %v3944_v30 }
0x15b6   : > { %3646 = vmatprep.subr.mxu1 %v3944_v30 }
0x15b7   : > { %3647 = vmatpush3.msra.mxu1 %v1896_v48 }
0x15b8   : > { %3648 = vmatprep.subr.mxu1 %v3944_v30 }
0x15b9   : > { %3649 = vmatpush3.msra.mxu1 %v1895_v49  ;;  %v4514_v49 = vld [vmem:[%s4746_s3 + $0x138] ss:$0 sm:$0xff] }
0x15ba   : > { %3650 = vmatprep.subr.mxu1 %v3944_v30 }
0x15bb   : > { %3651 = vmatpush3.msra.mxu1 %v1894_v50 }
0x15bc   : > { %3653 = vmatmul.mubr.msk.f32.vlgmr.msra.gmra.mxu1 %vm366_vm1, %v4352_v39  ;;  %3655 = vmatprep.subr.mxu1 %v3944_v30 }
0x15bd   : > { %3661 = vmatprep.mubr.msk.f32.mxu1 %vm3945_vm2, %v3944_v30  ;;  %3656 = vmatpush3.msk.msra.mxu1 %vm2002_vm7, %v4382_v53 }
0x15be   : > { %3657 = vmatprep.subr.mxu1 %v3944_v30 }
0x15bf   : > { %3658 = vmatpush3.msra.mxu1 %v4387_v54 }
0x15c0   : > { %3659 = vmatprep.subr.mxu1 %v3944_v30 }
0x15c1   : > { %3660 = vmatpush3.msra.mxu1 %v4397_v55 }
0x15c2   : > { %3664 = vmatprep.subr.mxu1 %v3944_v30 }
0x1674   : > { %v1890_v57 = vpop.f32.mrf.mxu1 }
0x1675   : > { %v1891_v58 = vadd.f32 %v1890_v57, %v1820_v56 }
0x1676   : > { %v3643_v59 = vpop.f32.mrf.mxu1 }
0x1677   : > { %1993 = vrot.lane.b32.xlu0 %v1891_v58, %s3950_s13 }
0x167c   : > { %v4404_v60 = vpop.f32.mrf.mxu1 }
0x167e   : > { %v3654_v61 = vpop.f32.mrf.mxu1 }
0x16e9   : > { %v1994_v63 = vpop.permute.xlu0 %1993 }
0x16ea   : > { %v1997_v0 = vsel %vm1996_vm8, %v1991_v62, %v1994_v63  ;;  %v4528_v63 = vld [vmem:[%s4746_s3 + $0x170] sm:$0xff] }
0x16eb   : > { %3662 = vmatmul.mubr.msk.f32.vlgmr.msra.gmra.mxu1 %vm1998_vm9, %v1997_v0  ;;  %v4533_v0 = vld [vmem:[%s4746_s3 + $0x168] sm:$0xff]  ;;  %3683 = vmatpush3.msra.mxu0 %v4528_v63 }
0x16ec   : > { %3672 = vmatprep.mubr.msk.f32.mxu1 %vm3945_vm2, %v3944_v30  ;;  %3665 = vmatpush3.msra.mxu1 %v4428_v14 }
0x16ed   : > { %3666 = vmatprep.subr.mxu1 %v3944_v30  ;;  %3684 = vmatprep.subr.mxu0 %v3944_v30 }
0x16ee   : > { %3667 = vmatpush3.msra.mxu1 %v4433_v15  ;;  %3685 = vmatpush3.msra.mxu0 %v4533_v0 }
0x16ef   : > { %3668 = vmatprep.subr.mxu1 %v3944_v30  ;;  %3686 = vmatprep.subr.mxu0 %v3944_v30 }
0x16f0   : > { %3669 = vmatpush3.msra.mxu1 %v4440_v16 }
0x16f1   : > { %3670 = vmatprep.subr.mxu1 %v3944_v30 }
0x16f2   : > { %3671 = vmatpush3.msra.mxu1 %v4451_v20 }
0x16f3   : > { %3675 = vmatprep.subr.mxu1 %v3944_v30 }
0x17ab   : > { %v2072_v2 = vpop.f32.mrf.mxu1 }
0x17ac   : > { %v2073_v3 = vadd.f32 %v2072_v2, %v4417_v1  ;;  %v4540_v2 = vld [vmem:[%s4746_s3 + $0x160] sm:$0xff] }
0x17ad   : > { %v3663_v4 = vpop.f32.mrf.mxu1  ;;  %3687 = vmatpush3.msra.mxu0 %v4540_v2 }
0x17ae   : > { %3869 = vtanh.f32 %v2073_v3  ;;  %v3362_v52 = vmul.f32 -1.442695, %v2073_v3  ;;  %v4547_v3 = vld [vmem:[%s4746_s3 + $0x158] sm:$0xff]  ;;  %3688 = vmatprep.subr.mxu0 %v3944_v30  ;;  %v4554_v4 = vld [vmem:[%s4746_s3 + $0x150] sm:$0xff] }
0x17af   : > { %3689 = vmatpush3.msra.mxu0 %v4547_v3 }
0x17b0   : > { %3871 = vpow2.f32 %v3362_v52  ;;  %3690 = vmatprep.subr.mxu0 %v3944_v30 }
0x17b1   : > { %3691 = vmatpush3.msra.mxu0 %v4554_v4 }
0x17b2   : > { %3692 = vmatprep.subr.mxu0 %v3944_v30 }
0x17bb   : > { %v3870_v5 = vpop.eup %3869 }
0x17bc   : > { %2085 = vrot.lane.b32.xlu1 %v3870_v5, %s3951_s21 }
0x17bd   : > { %v3872_v6 = vpop.eup %3871 }
0x17be   : > { %v2079_v7 = vadd.f32 1.0, %v3872_v6 }
0x17c0   : > { %3873 = vrcp.f32 %v2079_v7 }
0x17cd   : > { %v3874_v8 = vpop.eup %3873 }
0x17ce   : > { %v2083_v11 = vmul.f32 0.0, %v3874_v8 }
0x182e   : > { %v2086_v9 = vpop.permute.xlu1 %2085 }
0x182f   : > { %v2088_v10 = vmul.f32 %v3874_v8, %v2086_v9 }
0x1831   : > { %2090 = vrot.lane.b32.xlu1 %v2088_v10, %s3949_s14 }
0x18a3   : > { %v2091_v12 = vpop.permute.xlu1 %2090 }
0x18a4   : > { %v4422_v13 = vadd.f32 %v2091_v12, %v2083_v11 }
0x18a6   : > { %3875 = vtanh.f32 %v4422_v13 }
0x18b3   : > { %v3876_v17 = vpop.eup %3875 }
0x18b4   : > { %2096 = vrot.lane.b32.xlu0 %v3876_v17, %s3949_s14 }
0x18b8   : > { %2104 = vrot.lane.b32.xlu0 %v1891_v58, %s3949_s14  ;;  %v4521_v58 = vld [vmem:[%s4746_s3 + $0x140] ss:$0 sm:$0xff] }
0x1926   : > { %v2097_v21 = vpop.permute.xlu0 %2096 }
0x1927   : > { %v4455_v22 = vmul.f32 %v3874_v8, %v2097_v21 }
0x1929   : > { %2101 = vrot.lane.b32.xlu1 %v4455_v22, %s3947_s8 }
0x192a   : > { %v2105_v23 = vpop.permute.xlu0 %2104 }
0x199b   : > { %v2102_v24 = vpop.permute.xlu1 %2101 }
0x199c   : > { %v2107_v25 = vsel %vm461_vm3, %v2102_v24, %v2105_v23 }
0x199d   : > { %3673 = vmatmul.mubr.msk.f32.vlgmr.msra.gmra.mxu1 %vm366_vm1, %v2107_v25 }
0x199e   : > { %3679 = vmatprep.mubr.msk.f32.mxu1 %vm3945_vm2, %v3944_v30  ;;  %3676 = vmatpush3.msra.mxu1 %v4477_v19 }
0x199f   : > { %3677 = vmatprep.subr.mxu1 %v3944_v30 }
0x19a0   : > { %3678 = vmatpush3.msra.mxu1 %v4482_v41 }
0x19a1   : > { %3706 = vmatprep.subr.mxu1 %v3944_v30 }
0x1a5d   : > { %v2177_v27 = vpop.f32.mrf.mxu1 }
0x1a5e   : > { %v2178_v28 = vadd.f32 %v2177_v27, %v4466_v26 }
0x1a5f   : > { %v3674_v29 = vpop.f32.mrf.mxu1 }
0x1a60   : > { %3877 = vtanh.f32 %v2178_v28  ;;  %v3364_v32 = vmul.f32 -1.442695, %v2178_v28 }
0x1a62   : > { %3879 = vpow2.f32 %v3364_v32 }
0x1a6d   : > { %v3878_v31 = vpop.eup %3877 }
0x1a6e   : > { %2190 = vrot.lane.b32.xlu1 %v3878_v31, %s3951_s21 }
0x1a6f   : > { %v3880_v34 = vpop.eup %3879 }
0x1a70   : > { %v2184_v35 = vadd.f32 1.0, %v3880_v34 }
0x1a72   : > { %3881 = vrcp.f32 %v2184_v35 }
0x1a7f   : > { %v3882_v36 = vpop.eup %3881 }
0x1a80   : > { %v2188_v18 = vmul.f32 0.0, %v3882_v36 }
0x1ae0   : > { %v2191_v37 = vpop.permute.xlu1 %2190 }
0x1ae1   : > { %v2193_v38 = vmul.f32 %v3882_v36, %v2191_v37 }
0x1ae3   : > { %2195 = vrot.lane.b32.xlu0 %v2193_v38, %s3949_s14 }
0x1b55   : > { %v2196_v51 = vpop.permute.xlu0 %2195 }
0x1b56   : > { %v4471_v40 = vadd.f32 %v2196_v51, %v2188_v18 }
0x1b58   : > { %3883 = vtanh.f32 %v4471_v40 }
0x1b65   : > { %v3884_v42 = vpop.eup %3883 }
0x1b66   : > { %2201 = vrot.lane.b32.xlu1 %v3884_v42, %s3949_s14 }
0x1bd8   : > { %v2202_v43 = vpop.permute.xlu1 %2201 }
0x1bd9   : > { %v4489_v44 = vmul.f32 %v3882_v36, %v2202_v43  ;;  %v4567_v36 = vld [vmem:[%s4746_s3 + $0x148] sm:$0xff] }
0x1bda   : > { %3693 = vmatpush3.msra.mxu0 %v4567_v36 }
0x1bdb   : > { %2206 = vrot.lane.b32.xlu0 %v4489_v44, %s3947_s8  ;;  %3697 = vmatprep.subr.mxu0 %v3944_v30 }
0x1c4d   : > { %v4493_v45 = vpop.permute.xlu0 %2206 }
0x1c4e   : > { %3680 = vmatmul.mubr.msk.f32.vlgmr.msra.gmra.mxu1 %vm461_vm3, %v4493_v45 }
0x1c4f   : > { %3707 = vmatpush3.msra.mxu1 %v4428_v14  ;;  %3714 = vmatprep.mubr.msk.f32.mxu1 %vm3945_vm2, %v3944_v30 }
0x1c50   : > { %3708 = vmatprep.subr.mxu1 %v3944_v30 }
0x1c51   : > { %3709 = vmatpush3.msra.mxu1 %v4433_v15 }
0x1c52   : > { %3710 = vmatprep.subr.mxu1 %v3944_v30 }
0x1c53   : > { %3711 = vmatpush3.msra.mxu1 %v4440_v16 }
0x1c54   : > { %3712 = vmatprep.subr.mxu1 %v3944_v30 }
0x1c55   : > { %3713 = vmatpush3.msra.mxu1 %v4451_v20 }
0x1c56   : > { %3739 = vmatprep.subr.mxu1 %v3944_v30 }
0x1d0e   : > { %v2276_v47 = vpop.f32.mrf.mxu1 }
0x1d0f   : > { %v2283_v48 = vrot.slane %v2276_v47, %v4508_v46 }
0x1d10   : > { %v3681_v50 = vpop.f32.mrf.mxu1 }
0x1d11   : > { %v2284_v56 = vadd.f32 %v2283_v48, %v4404_v60 }
0x1d13   : > { %v2289_v57 = vadd.f32 %v4514_v49, %v2284_v56 }
0x1d15   : > { %3885 = vtanh.f32 %v2289_v57 }
0x1d22   : > { %v3886_v59 = vpop.eup %3885 }
0x1d23   : > { %v2295_v61 = vmul.f32 %v3886_v59, %v4521_v58 }
0x1d25   : > { %v2296_v62 = vsel %vm461_vm3, %v2295_v61, 0.0 }
0x1d26   : > { %2297 = vadd.xlane.f32.xlu1 %v2296_v62 }
0x1daf   : > { %v2298_v5 = vpop.xlane.xlu1 %2297 }
0x1db0   : > { %v2299_v52 = vsel %vm216_vm6, %v2298_v5, -1e+30 }
0x1db1   : > { %v2300_v6 = vrot.slane %v2299_v52, 4 }
0x1db3   : > { %v2301_v7 = vmax.f32 %v2299_v52, %v2300_v6 }
0x1db5   : > { %v2302_v8 = vrot.slane %v2301_v7, 2 }
0x1db7   : > { %v2303_v9 = vmax.f32 %v2301_v7, %v2302_v8 }
0x1db9   : > { %v2304_v10 = vrot.slane %v2303_v9, 1 }
0x1dbb   : > { %v2305_v11 = vmax.f32 %v2303_v9, %v2304_v10 }
0x1dbd   : > { %v2306_v12 = vsub.f32 %v2299_v52, %v2305_v11 }
0x1dbf   : > { %v2307_v17 = vmul.f32 1.442695, %v2306_v12 }
0x1dc1   : > { %3887 = vpow2.f32 %v2307_v17 }
0x1dce   : > { %v3888_v21 = vpop.eup %3887 }
0x1dcf   : > { %v2309_v23 = vrot.slane %v3888_v21, 4 }
0x1dd1   : > { %v2310_v24 = vadd.f32 %v3888_v21, %v2309_v23 }
0x1dd3   : > { %v2311_v25 = vrot.slane %v2310_v24, 2 }
0x1dd5   : > { %v2312_v27 = vadd.f32 %v2311_v25, %v2310_v24 }
0x1dd7   : > { %v2313_v28 = vrot.slane %v2312_v27, 1 }
0x1dd9   : > { %v2314_v29 = vadd.f32 %v2313_v28, %v2312_v27 }
0x1ddb   : > { %3889 = vrcp.f32 %v2314_v29 }
0x1de8   : > { %v3890_v31 = vpop.eup %3889 }
0x1de9   : > { %v2316_v32 = vmul.f32 %v3890_v31, %v3888_v21 }
0x1deb   : > { %v2317_v34 = vmul.f32 %v2316_v32, %v4352_v39 }
0x1ded   : > { %v2318_v35 = vsel %vm366_vm1, %v2317_v34, 0.0 }
0x1dee   : > { %v2319_v37 = vrot.slane %v2318_v35, 4 }
0x1df0   : > { %v2320_v38 = vadd.f32 %v2319_v37, %v2318_v35 }
0x1df2   : > { %v2321_v18 = vrot.slane %v2320_v38, 2 }
0x1df4   : > { %v2322_v51 = vadd.f32 %v2321_v18, %v2320_v38 }
0x1df6   : > { %v2323_v42 = vrot.slane %v2322_v51, 1 }
0x1df8   : > { %v2324_v43 = vadd.f32 %v2323_v42, %v2322_v51 }
0x1dfa   : > { %2327 = vrot.lane.b32.xlu0 %v2324_v43, %s3949_s14 }
0x1dfe   : > { %2405 = vrot.lane.b32.xlu0 %v4455_v22, %s3952_s6  ;;  %v4589_v22 = vld [vmem:[%s4746_s3 + $0x178] sm:$0x1] }
0x1e6c   : > { %v2328_v47 = vpop.permute.xlu0 %2327 }
0x1e6d   : > { %v2330_v48 = vsel %vm461_vm3, %v4493_v45, %v2328_v47 }
0x1e6e   : > { %3695 = vmatmul.mubr.msk.f32.vlgmr.msra.gmra.mxu0 %vm2331_vm10, %v2330_v48 }
0x1e6f   : > { %3698 = vmatpush3.msk.msra.mxu0 %vm2002_vm7, %v4382_v53  ;;  %3703 = vmatprep.mubr.msk.f32.mxu0 %vm3945_vm2, %v3944_v30 }
0x1e70   : > { %3699 = vmatprep.subr.mxu0 %v3944_v30  ;;  %v2406_v56 = vpop.permute.xlu0 %2405 }
0x1e71   : > { %3700 = vmatpush3.msra.mxu0 %v4387_v54 }
0x1e72   : > { %3701 = vmatprep.subr.mxu0 %v3944_v30 }
0x1e73   : > { %3702 = vmatpush3.msra.mxu0 %v4397_v55 }
0x1e74   : > { %3717 = vmatprep.subr.mxu0 %v3944_v30 }
0x1f2e   : > { %v2401_v45 = vpop.f32.mrf.mxu0 }
0x1f2f   : > { %v4592_v50 = vadd.f32 %v2401_v45, %v4589_v22 }
0x1f30   : > { %v3696_v57 = vpop.f32.mrf.mxu0 }
0x1f31   : > { %v2408_v59 = vsel %vm1996_vm8, %v4592_v50, %v2406_v56 }
0x1f32   : > { %3704 = vmatmul.mubr.msk.f32.vlgmr.msra.gmra.mxu0 %vm1998_vm9, %v2408_v59 }
0x1f33   : > { %3718 = vmatpush3.msra.mxu0 %v4477_v19  ;;  %3721 = vmatprep.mubr.msk.f32.mxu0 %vm3945_vm2, %v3944_v30 }
0x1f34   : > { %3719 = vmatprep.subr.mxu0 %v3944_v30 }
0x1f35   : > { %3720 = vmatpush3.msra.mxu0 %v4482_v41 }
0x1f36   : > { %3724 = vmatprep.subr.mxu0 %v3944_v30 }
0x1ff2   : > { %v2478_v61 = vpop.f32.mrf.mxu0 }
0x1ff3   : > { %v2479_v62 = vadd.f32 %v2478_v61, %v4417_v1 }
0x1ff4   : > { %v3705_v5 = vpop.f32.mrf.mxu0 }
0x1ff5   : > { %3891 = vtanh.f32 %v2479_v62  ;;  %v3371_v6 = vmul.f32 -1.442695, %v2479_v62 }
0x1ff7   : > { %3893 = vpow2.f32 %v3371_v6 }
0x2002   : > { %v3892_v52 = vpop.eup %3891 }
0x2003   : > { %2491 = vrot.lane.b32.xlu0 %v3892_v52, %s3951_s21 }
0x2004   : > { %v3894_v7 = vpop.eup %3893 }
0x2005   : > { %v2485_v8 = vadd.f32 1.0, %v3894_v7 }
0x2007   : > { %3895 = vrcp.f32 %v2485_v8 }
0x2014   : > { %v3896_v9 = vpop.eup %3895 }
0x2015   : > { %v2489_v12 = vmul.f32 %v3896_v9, %v4422_v13 }
0x2075   : > { %v2492_v10 = vpop.permute.xlu0 %2491 }
0x2076   : > { %v2494_v11 = vmul.f32 %v3896_v9, %v2492_v10 }
0x2078   : > { %2496 = vrot.lane.b32.xlu0 %v2494_v11, %s3949_s14 }
0x20ea   : > { %v2497_v17 = vpop.permute.xlu0 %2496 }
0x20eb   : > { %v4607_v21 = vadd.f32 %v2497_v17, %v2489_v12 }
0x20ed   : > { %3897 = vtanh.f32 %v4607_v21 }
0x20fa   : > { %v3898_v23 = vpop.eup %3897 }
0x20fb   : > { %2502 = vrot.lane.b32.xlu0 %v3898_v23, %s3949_s14 }
0x216d   : > { %v2503_v24 = vpop.permute.xlu0 %2502 }
0x216e   : > { %v4611_v25 = vmul.f32 %v3896_v9, %v2503_v24 }
0x2170   : > { %2507 = vrot.lane.b32.xlu0 %v4611_v25, %s3947_s8 }
0x2174   : > { %2510 = vrot.lane.b32.xlu0 %v4489_v44, %s3946_s7 }
0x21e2   : > { %v2508_v27 = vpop.permute.xlu0 %2507 }
0x21e6   : > { %v2511_v28 = vpop.permute.xlu0 %2510 }
0x21e7   : > { %v2513_v13 = vsel %vm461_vm3, %v2508_v27, %v2511_v28 }
0x21e8   : > { %3715 = vmatmul.mubr.msk.f32.vlgmr.msra.gmra.mxu1 %vm366_vm1, %v2513_v13 }
0x21e9   : > { %3740 = vmatpush3.msk.msra.mxu1 %vm2002_vm7, %v4382_v53  ;;  %3745 = vmatprep.mubr.msk.f32.mxu1 %vm3945_vm2, %v3944_v30 }
0x21ea   : > { %3741 = vmatprep.subr.mxu1 %v3944_v30 }
0x21eb   : > { %3742 = vmatpush3.msra.mxu1 %v4387_v54 }
0x21ec   : > { %3743 = vmatprep.subr.mxu1 %v3944_v30 }
0x21ed   : > { %3744 = vmatpush3.msra.mxu1 %v4397_v55 }
0x21ee   : > { %3748 = vmatprep.subr.mxu1 %v3944_v30 }
0x22a8   : > { %v2583_v44 = vpop.f32.mrf.mxu1 }
0x22a9   : > { %v2584_v29 = vadd.f32 %v2583_v44, %v4466_v26 }
0x22aa   : > { %v3716_v31 = vpop.f32.mrf.mxu1 }
0x22ab   : > { %3899 = vtanh.f32 %v2584_v29  ;;  %v3373_v53 = vmul.f32 -1.442695, %v2584_v29 }
0x22ad   : > { %3901 = vpow2.f32 %v3373_v53 }
0x22b8   : > { %v3900_v32 = vpop.eup %3899 }
0x22b9   : > { %2596 = vrot.lane.b32.xlu0 %v3900_v32, %s3951_s21 }
0x22ba   : > { %v3902_v34 = vpop.eup %3901 }
0x22bb   : > { %v2590_v35 = vadd.f32 1.0, %v3902_v34 }
0x22bd   : > { %3903 = vrcp.f32 %v2590_v35 }
0x22ca   : > { %v3904_v54 = vpop.eup %3903 }
0x22cb   : > { %v2594_v55 = vmul.f32 %v3904_v54, %v4471_v40 }
0x232b   : > { %v2597_v37 = vpop.permute.xlu0 %2596 }
0x232c   : > { %v2599_v38 = vmul.f32 %v3904_v54, %v2597_v37 }
0x232e   : > { %2601 = vrot.lane.b32.xlu0 %v2599_v38, %s3949_s14 }
0x23a0   : > { %v2602_v18 = vpop.permute.xlu0 %2601 }
0x23a1   : > { %v4632_v51 = vadd.f32 %v2602_v18, %v2594_v55 }
0x23a3   : > { %3905 = vtanh.f32 %v4632_v51 }
0x23b0   : > { %v3906_v42 = vpop.eup %3905 }
0x23b1   : > { %2607 = vrot.lane.b32.xlu1 %v3906_v42, %s3949_s14 }
0x2423   : > { %v2608_v43 = vpop.permute.xlu1 %2607 }
0x2424   : > { %v4636_v47 = vmul.f32 %v3904_v54, %v2608_v43 }
0x2426   : > { %2612 = vrot.lane.b32.xlu0 %v4636_v47, %s3947_s8 }
0x2498   : > { %v2613_v48 = vpop.permute.xlu0 %2612 }
0x2499   : > { %3722 = vmatmul.mubr.msk.f32.vlgmr.msra.gmra.mxu0 %vm461_vm3, %v2613_v48 }
0x249a   : > { %3725 = vmatpush3.msra.mxu0 %v4528_v63  ;;  %3736 = vmatprep.mubr.msk.f32.mxu0 %vm3945_vm2, %v3944_v30 }
0x249b   : > { %3726 = vmatprep.subr.mxu0 %v3944_v30 }
0x249c   : > { %3727 = vmatpush3.msra.mxu0 %v4533_v0 }
0x249d   : > { %3728 = vmatprep.subr.mxu0 %v3944_v30 }
0x249e   : > { %3729 = vmatpush3.msra.mxu0 %v4540_v2 }
0x249f   : > { %3730 = vmatprep.subr.mxu0 %v3944_v30 }
0x24a0   : > { %3731 = vmatpush3.msra.mxu0 %v4547_v3 }
0x24a1   : > { %3732 = vmatprep.subr.mxu0 %v3944_v30 }
0x24a2   : > { %3733 = vmatpush3.msra.mxu0 %v4554_v4 }
0x24a3   : > { %3734 = vmatprep.subr.mxu0 %v3944_v30 }
0x24a4   : > { %3735 = vmatpush3.msra.mxu0 %v4567_v36 }
0x24a5   : > { %3759 = vmatprep.subr.mxu0 %v3944_v30 }
0x2559   : > { %v2682_v40 = vpop.f32.mrf.mxu0 }
0x255a   : > { %v2689_v45 = vrot.slane %v2682_v40, %v4508_v46 }
0x255b   : > { %v3723_v56 = vpop.f32.mrf.mxu0 }
0x255c   : > { %v2690_v57 = vadd.f32 %v2689_v45, %v4404_v60 }
0x255e   : > { %v2691_v59 = vadd.f32 %v4514_v49, %v2690_v57 }
0x2560   : > { %3907 = vtanh.f32 %v2691_v59 }
0x256d   : > { %v3908_v61 = vpop.eup %3907 }
0x256e   : > { %v2693_v62 = vmul.f32 %v3908_v61, %v4521_v58 }
0x2570   : > { %v2694_v5 = vsel %vm461_vm3, %v2693_v62, 0.0 }
0x2571   : > { %2695 = vadd.xlane.f32.xlu0 %v2694_v5 }
0x25fa   : > { %v2696_v52 = vpop.xlane.xlu0 %2695 }
0x25fb   : > { %v2697_v6 = vsel %vm216_vm6, %v2696_v52, -1e+30 }
0x25fc   : > { %v2698_v7 = vrot.slane %v2697_v6, 4 }
0x25fe   : > { %v2699_v8 = vmax.f32 %v2697_v6, %v2698_v7 }
0x2600   : > { %v2700_v9 = vrot.slane %v2699_v8, 2 }
0x2602   : > { %v2701_v10 = vmax.f32 %v2699_v8, %v2700_v9 }
0x2604   : > { %v2702_v11 = vrot.slane %v2701_v10, 1 }
0x2606   : > { %v2703_v12 = vmax.f32 %v2701_v10, %v2702_v11 }
0x2608   : > { %v2704_v17 = vsub.f32 %v2697_v6, %v2703_v12 }
0x260a   : > { %v2705_v23 = vmul.f32 1.442695, %v2704_v17 }
0x260c   : > { %3909 = vpow2.f32 %v2705_v23 }
0x2619   : > { %v3910_v24 = vpop.eup %3909 }
0x261a   : > { %v2707_v27 = vrot.slane %v3910_v24, 4 }
0x261c   : > { %v2708_v28 = vadd.f32 %v3910_v24, %v2707_v27 }
0x261e   : > { %v2709_v13 = vrot.slane %v2708_v28, 2 }
0x2620   : > { %v2710_v44 = vadd.f32 %v2709_v13, %v2708_v28 }
0x2622   : > { %v2711_v29 = vrot.slane %v2710_v44, 1 }
0x2624   : > { %v2712_v31 = vadd.f32 %v2711_v29, %v2710_v44 }
0x2626   : > { %3911 = vrcp.f32 %v2712_v31 }
0x2633   : > { %v3912_v32 = vpop.eup %3911 }
0x2634   : > { %v2714_v53 = vmul.f32 %v3912_v32, %v3910_v24 }
0x2636   : > { %v2715_v34 = vmul.f32 %v2714_v53, %v4352_v39 }
0x2638   : > { %v2716_v35 = vsel %vm366_vm1, %v2715_v34, 0.0 }
0x2639   : > { %v2717_v54 = vrot.slane %v2716_v35, 4 }
0x263b   : > { %v2718_v37 = vadd.f32 %v2717_v54, %v2716_v35 }
0x263d   : > { %v2719_v38 = vrot.slane %v2718_v37, 2 }
0x263f   : > { %v2720_v55 = vadd.f32 %v2719_v38, %v2718_v37 }
0x2641   : > { %v2721_v18 = vrot.slane %v2720_v55, 1 }
0x2643   : > { %v2722_v42 = vadd.f32 %v2721_v18, %v2720_v55 }
0x2645   : > { %2725 = vrot.lane.b32.xlu1 %v2722_v42, %s3949_s14 }
0x2649   : > { %2802 = vrot.lane.b32.xlu1 %v4611_v25, %s3952_s6 }
0x26b7   : > { %v2726_v43 = vpop.permute.xlu1 %2725 }
0x26b8   : > { %v2728_v40 = vsel %vm461_vm3, %v2613_v48, %v2726_v43 }
0x26b9   : > { %3737 = vmatmul.mubr.msk.f32.vlgmr.msra.gmra.mxu0 %vm2331_vm10, %v2728_v40 }
0x26ba   : > { %3760 = vmatpush3.msra.mxu0 %v4477_v19  ;;  %3763 = vmatprep.mubr.msk.f32.mxu0 %vm3945_vm2, %v3944_v30 }
0x26bb   : > { %3761 = vmatprep.subr.mxu0 %v3944_v30  ;;  %v2803_v57 = vpop.permute.xlu1 %2802 }
0x26bc   : > { %3762 = vmatpush3.msra.mxu0 %v4482_v41 }
0x2779   : > { %v2798_v45 = vpop.f32.mrf.mxu0 }
0x277a   : > { %v4675_v56 = vadd.f32 %v2798_v45, %v4589_v22 }
0x277b   : > { %v3738_v25 = vpop.f32.mrf.mxu0 }
0x277c   : > { %v2805_v48 = vsel %vm1996_vm8, %v4675_v56, %v2803_v57 }
0x277d   : > { %3746 = vmatmul.mubr.msk.f32.vlgmr.msra.gmra.mxu1 %vm1998_vm9, %v2805_v48 }
0x277e   : > { %3749 = vmatpush3.msra.mxu1 %v4428_v14  ;;  %3756 = vmatprep.mubr.msk.f32.mxu1 %vm3945_vm2, %v3944_v30 }
0x277f   : > { %3750 = vmatprep.subr.mxu1 %v3944_v30 }
0x2780   : > { %3751 = vmatpush3.msra.mxu1 %v4433_v15 }
0x2781   : > { %3752 = vmatprep.subr.mxu1 %v3944_v30 }
0x2782   : > { %3753 = vmatpush3.msra.mxu1 %v4440_v16 }
0x2783   : > { %3754 = vmatprep.subr.mxu1 %v3944_v30 }
0x2784   : > { %3755 = vmatpush3.msra.mxu1 %v4451_v20 }
0x2785   : > { %3766 = vmatprep.subr.mxu1 %v3944_v30 }
0x283d   : > { %v2875_v19 = vpop.f32.mrf.mxu1 }
0x283e   : > { %v2876_v14 = vadd.f32 %v2875_v19, %v4417_v1 }
0x283f   : > { %v3747_v41 = vpop.f32.mrf.mxu1 }
0x2840   : > { %3913 = vtanh.f32 %v2876_v14  ;;  %v3378_v61 = vmul.f32 -1.442695, %v2876_v14 }
0x2842   : > { %3915 = vpow2.f32 %v3378_v61 }
0x284d   : > { %v3914_v59 = vpop.eup %3913 }
0x284e   : > { %2888 = vrot.lane.b32.xlu1 %v3914_v59, %s3951_s21 }
0x284f   : > { %v3916_v15 = vpop.eup %3915 }
0x2850   : > { %v2882_v62 = vadd.f32 1.0, %v3916_v15 }
0x2852   : > { %3917 = vrcp.f32 %v2882_v62 }
0x285f   : > { %v3918_v16 = vpop.eup %3917 }
0x2860   : > { %v2886_v20 = vmul.f32 %v3918_v16, %v4607_v21 }
0x28c0   : > { %v2889_v5 = vpop.permute.xlu1 %2888 }
0x28c1   : > { %v2891_v52 = vmul.f32 %v3918_v16, %v2889_v5 }
0x28c3   : > { %2893 = vrot.lane.b32.xlu1 %v2891_v52, %s3949_s14 }
0x2935   : > { %v2894_v6 = vpop.permute.xlu1 %2893 }
0x2936   : > { %v2896_v7 = vadd.f32 %v2894_v6, %v2886_v20 }
0x2938   : > { %3919 = vtanh.f32 %v2896_v7 }
0x2945   : > { %v3920_v1 = vpop.eup %3919 }
0x2946   : > { %2899 = vrot.lane.b32.xlu1 %v3920_v1, %s3949_s14  ;;  %v3200_v1 = vrot.slane %v4675_v56, 7 }
0x294a   : > { %2907 = vrot.lane.b32.xlu1 %v4636_v47, %s3946_s7  ;;  %s3279_s7 = sshll.u32 %s4749_s16, 2 }
0x294b   : > { %s209_s12 = scalar_lea.vmem %s4747_s4, %s3279_s7 }
0x29b8   : > { %v2900_v8 = vpop.permute.xlu1 %2899 }
0x29b9   : > { %v2902_v9 = vmul.f32 %v3918_v16, %v2900_v8 }
0x29bb   : > { %2904 = vrot.lane.b32.xlu0 %v2902_v9, %s3947_s8 }
0x29bc   : > { %v2908_v10 = vpop.permute.xlu1 %2907 }
0x2a2d   : > { %v2905_v11 = vpop.permute.xlu0 %2904 }
0x2a2e   : > { %v2910_v12 = vsel %vm461_vm3, %v2905_v11, %v2908_v10  ;;  %v3206_v11 = vsel %vm3205_vm11, %v4592_v50, %v3200_v1 }
0x2a2f   : > { %3757 = vmatmul.mubr.msk.f32.vlgmr.msra.gmra.mxu1 %vm366_vm1, %v2910_v12 }
0x2a30   : > { %3767 = vmatpush3.msra.mxu1 %v4528_v63  ;;  %3778 = vmatprep.mubr.msk.f32.mxu1 %vm3945_vm2, %v3944_v30 }
0x2a31   : > { %3768 = vmatprep.subr.mxu1 %v3944_v30 }
0x2a32   : > { %3769 = vmatpush3.msra.mxu1 %v4533_v0 }
0x2a33   : > { %3770 = vmatprep.subr.mxu1 %v3944_v30 }
0x2a34   : > { %3771 = vmatpush3.msra.mxu1 %v4540_v2 }
0x2a35   : > { %3772 = vmatprep.subr.mxu1 %v3944_v30 }
0x2a36   : > { %3773 = vmatpush3.msra.mxu1 %v4547_v3 }
0x2a37   : > { %3774 = vmatprep.subr.mxu1 %v3944_v30 }
0x2a38   : > { %3775 = vmatpush3.msra.mxu1 %v4554_v4 }
0x2a39   : > { %3776 = vmatprep.subr.mxu1 %v3944_v30 }
0x2a3a   : > { %3777 = vmatpush3.msra.mxu1 %v4567_v36 }
0x2aef   : > { %v2980_v63 = vpop.f32.mrf.mxu1 }
0x2af0   : > { %v2981_v21 = vadd.f32 %v2980_v63, %v4466_v26 }
0x2af1   : > { %v3758_v0 = vpop.f32.mrf.mxu1 }
0x2af2   : > { %3921 = vtanh.f32 %v2981_v21  ;;  %v3380_v2 = vmul.f32 -1.442695, %v2981_v21 }
0x2af4   : > { %3923 = vpow2.f32 %v3380_v2 }
0x2aff   : > { %v3922_v47 = vpop.eup %3921 }
0x2b00   : > { %2993 = vrot.lane.b32.xlu1 %v3922_v47, %s3951_s21 }
0x2b01   : > { %v3924_v17 = vpop.eup %3923 }
0x2b02   : > { %v2987_v3 = vadd.f32 1.0, %v3924_v17 }
0x2b04   : > { %3925 = vrcp.f32 %v2987_v3 }
0x2b11   : > { %v3926_v23 = vpop.eup %3925 }
0x2b12   : > { %v2991_v30 = vmul.f32 %v3926_v23, %v4632_v51 }
0x2b72   : > { %v2994_v24 = vpop.permute.xlu1 %2993 }
0x2b73   : > { %v2996_v4 = vmul.f32 %v3926_v23, %v2994_v24 }
0x2b75   : > { %2998 = vrot.lane.b32.xlu1 %v2996_v4, %s3949_s14 }
0x2be7   : > { %v2999_v36 = vpop.permute.xlu1 %2998 }
0x2be8   : > { %v3001_v27 = vadd.f32 %v2999_v36, %v2991_v30 }
0x2bea   : > { %3927 = vtanh.f32 %v3001_v27 }
0x2bf7   : > { %v3928_v26 = vpop.eup %3927 }
0x2bf8   : > { %3004 = vrot.lane.b32.xlu1 %v3928_v26, %s3949_s14 }
0x2c6a   : > { %v3005_v28 = vpop.permute.xlu1 %3004 }
0x2c6b   : > { %v3007_v13 = vmul.f32 %v3926_v23, %v3005_v28 }
0x2c6d   : > { %3009 = vrot.lane.b32.xlu1 %v3007_v13, %s3947_s8 }
0x2cdf   : > { %v3010_v44 = vpop.permute.xlu1 %3009 }
0x2ce0   : > { %3764 = vmatmul.mubr.msk.f32.vlgmr.msra.gmra.mxu0 %vm461_vm3, %v3010_v44 }
0x2da0   : > { %v3079_v29 = vpop.f32.mrf.mxu0 }
0x2da1   : > { %v3086_v31 = vrot.slane %v3079_v29, %v4508_v46 }
0x2da2   : > { %v3765_v32 = vpop.f32.mrf.mxu0 }
0x2da3   : > { %v3087_v53 = vadd.f32 %v3086_v31, %v4404_v60 }
0x2da5   : > { %v3088_v51 = vadd.f32 %v4514_v49, %v3087_v53 }
0x2da7   : > { %3929 = vtanh.f32 %v3088_v51 }
0x2db4   : > { %v3930_v34 = vpop.eup %3929 }
0x2db5   : > { %v3090_v35 = vmul.f32 %v3930_v34, %v4521_v58 }
0x2db7   : > { %v3091_v54 = vsel %vm461_vm3, %v3090_v35, 0.0 }
0x2db8   : > { %3092 = vadd.xlane.f32.xlu1 %v3091_v54 }
0x2e41   : > { %v3093_v37 = vpop.xlane.xlu1 %3092 }
0x2e42   : > { %v3094_v38 = vsel %vm216_vm6, %v3093_v37, -1e+30 }
0x2e43   : > { %v3095_v55 = vrot.slane %v3094_v38, 4 }
0x2e45   : > { %v3096_v18 = vmax.f32 %v3094_v38, %v3095_v55 }
0x2e47   : > { %v3097_v42 = vrot.slane %v3096_v18, 2 }
0x2e49   : > { %v3098_v46 = vmax.f32 %v3096_v18, %v3097_v42 }
0x2e4b   : > { %v3099_v43 = vrot.slane %v3098_v46, 1 }
0x2e4d   : > { %v3100_v40 = vmax.f32 %v3098_v46, %v3099_v43 }
0x2e4f   : > { %v3101_v60 = vsub.f32 %v3094_v38, %v3100_v40 }
0x2e51   : > { %v3102_v45 = vmul.f32 1.442695, %v3101_v60 }
0x2e53   : > { %3931 = vpow2.f32 %v3102_v45 }
0x2e60   : > { %v3932_v49 = vpop.eup %3931 }
0x2e61   : > { %v3104_v57 = vrot.slane %v3932_v49, 4 }
0x2e63   : > { %v3105_v25 = vadd.f32 %v3932_v49, %v3104_v57 }
0x2e65   : > { %v3106_v58 = vrot.slane %v3105_v25, 2 }
0x2e67   : > { %v3107_v48 = vadd.f32 %v3106_v58, %v3105_v25 }
0x2e69   : > { %v3108_v19 = vrot.slane %v3107_v48, 1 }
0x2e6b   : > { %v3109_v14 = vadd.f32 %v3108_v19, %v3107_v48 }
0x2e6d   : > { %3933 = vrcp.f32 %v3109_v14 }
0x2e7a   : > { %v3934_v33 = vpop.eup %3933 }
0x2e7b   : > { %v3111_v41 = vmul.f32 %v3934_v33, %v3932_v49 }
0x2e7d   : > { %v3112_v59 = vmul.f32 %v3111_v41, %v4352_v39 }
0x2e7f   : > { %v3113_v61 = vsel %vm366_vm1, %v3112_v59, 0.0 }
0x2e80   : > { %v3114_v15 = vrot.slane %v3113_v61, 4 }
0x2e82   : > { %v3115_v62 = vadd.f32 %v3114_v15, %v3113_v61 }
0x2e84   : > { %v3116_v16 = vrot.slane %v3115_v62, 2 }
0x2e86   : > { %v3117_v5 = vadd.f32 %v3116_v16, %v3115_v62 }
0x2e88   : > { %v3118_v52 = vrot.slane %v3117_v5, 1 }
0x2e8a   : > { %v3119_v20 = vadd.f32 %v3118_v52, %v3117_v5 }
0x2e8c   : > { %3122 = vrot.lane.b32.xlu0 %v3119_v20, %s3949_s14 }
0x2efe   : > { %v3123_v6 = vpop.permute.xlu0 %3122 }
0x2eff   : > { %v3125_v7 = vsel %vm461_vm3, %v3010_v44, %v3123_v6 }
0x2f00   : > { %3779 = vmatmul.mubr.msk.f32.vlgmr.msra.gmra.mxu1 %vm2331_vm10, %v3125_v7 }
0x2fc0   : > { %v3195_v8 = vpop.f32.mrf.mxu1 }
0x2fc1   : > { %v3196_v39 = vadd.f32 %v3195_v8, %v4589_v22 }
0x2fc2   : > { %v3780_v9 = vpop.f32.mrf.mxu1 }
0x2fc3   : > { %v3203_v10 = vrot.slane %v3196_v39, 6 }
0x2fc5   : > { %v3207_v12 = vsel %vm2002_vm7, %v3206_v11, %v3203_v10 }
0x2fc6   : > { %3209 = vst.msk [vmem:[%s209_s12] sm:$0x7] %vm3208_vm12, %v3207_v12 }
0x2fc7 PF: > { %s14_s15 = sadd.s32 1, %s3941_s15  }
0x2fc8   : > { %p11_p4 = scmp.ge.s32.totalorder %s14_s15, 4  }
0x2fca   :  { %13 = sbr.rel (!%p11_p4) target bundleno = 1 (0x1), region = 69 }

</bundles_post_ra>
